<compile_context>
chip_gen: v6e
topology: v6e:2x2x1
jax: 0.10.0
libtpu: 0.0.40
codegen_flags: <defaults>
</compile_context>

<pallas_src>
import jax
import jax.numpy as jnp
from jax.experimental import pallas as pl
from jax.experimental.pallas import tpu as pltpu


# --------------------------- model configuration ---------------------------

VOCAB = 128
HIDDEN = 32
NUM_HEADS = 4
HEAD_DIM = HIDDEN // NUM_HEADS                     # 8
FFN = 64
PATCH = 4
IMG_C, IMG_H, IMG_W = 3, 16, 16
N_PATCHES = (IMG_H // PATCH) * (IMG_W // PATCH)    # 16
PATCH_DIM = IMG_C * PATCH * PATCH                  # 48
CAP_LEN = 8
TOTAL_T = N_PATCHES + CAP_LEN                      # 24
LN_EPS = 1e-12
ATTN_SCALE = 1.0 / (HEAD_DIM ** 0.5)


# ------------------------------ fused kernel -------------------------------

def _layernorm(x, gb, eps=LN_EPS):
    """x: [..., H]; gb: [2, H] with row 0 = gamma, row 1 = beta."""
    mu = jnp.mean(x, axis=-1, keepdims=True)
    xc = x - mu
    var = jnp.mean(xc * xc, axis=-1, keepdims=True)
    return xc * jax.lax.rsqrt(var + eps) * gb[0:1, :] + gb[1:2, :]


def _gelu(x):
    # TODO(synk): tanh-approx GELU; PyTorch nn.GELU default is the exact erf
    # form (exact activation of ViCapBERT unknown).
    return jax.nn.gelu(x, approximate=True)


def _fused_forward_kernel(
    patches_ref, cap_emb_ref, pos_emb_ref,
    patch_w_ref, patch_b_ref, ln_emb_ref,
    w_qkv_ref, b_qkv_ref, wo_ref, bo_ref, ln1_ref,
    w_ff1_ref, b_ff1_ref, w_ff2_ref, b_ff2_ref, ln2_ref,
    w_vocab_ref, b_vocab_ref,
    logits_ref,
):
    b_tile = patches_ref.shape[0]          # static block shape
    m = b_tile * TOTAL_T                   # batch folded into matmul M dim

    # ---- patch embedding: one matmul with M = b_tile * N_PATCHES ----
    patches = patches_ref[...].reshape(b_tile * N_PATCHES, PATCH_DIM)
    img_tok = (jnp.dot(patches, patch_w_ref[...],
                       preferred_element_type=jnp.float32)
               + patch_b_ref[...]).reshape(b_tile, N_PATCHES, HIDDEN)

    # ---- build sequence in vregs (no VMEM scratch round trip) ----
    seq = jnp.concatenate([img_tok, cap_emb_ref[...]], axis=1)     # [B, T, H]
    x = _layernorm(seq + pos_emb_ref[...], ln_emb_ref[...])
    x = x.reshape(m, HIDDEN)                                       # [B*T, H]

    # ---- fused QKV projection: one MXU pass with M = B*T, N = 3*HIDDEN ----
    qkv = (jnp.dot(x, w_qkv_ref[...], preferred_element_type=jnp.float32)
           + b_qkv_ref[...]).reshape(b_tile, TOTAL_T, 3 * HIDDEN)

    # ---- multi-head self-attention (dots batched over the sample tile) ----
    # TODO(synk): no attention mask applied (bidirectional over image+caption);
    # if ViCapBERT uses a causal mask over caption positions this needs one.
    ctx_heads = []
    for h in range(NUM_HEADS):             # 4-way static unroll over heads
        lo = h * HEAD_DIM
        qh = qkv[:, :, lo:lo + HEAD_DIM]                             # [B, T, dh]
        kh = qkv[:, :, HIDDEN + lo:HIDDEN + lo + HEAD_DIM]           # [B, T, dh]
        vh = qkv[:, :, 2 * HIDDEN + lo:2 * HIDDEN + lo + HEAD_DIM]   # [B, T, dh]
        s = jnp.einsum('bqd,bkd->bqk', qh, kh,
                       preferred_element_type=jnp.float32) * ATTN_SCALE
        s = s - jnp.max(s, axis=-1, keepdims=True)
        p = jnp.exp(s)
        p = p * pl.reciprocal(jnp.sum(p, axis=-1, keepdims=True), approx=True)
        ctx_heads.append(jnp.einsum('bqk,bkd->bqd', p, vh,
                                    preferred_element_type=jnp.float32))
    ctx = jnp.concatenate(ctx_heads, axis=-1).reshape(m, HIDDEN)     # [B*T, H]

    attn_out = jnp.dot(ctx, wo_ref[...],
                       preferred_element_type=jnp.float32) + bo_ref[...]
    x = _layernorm(x + attn_out, ln1_ref[...])

    # ---- feed-forward ----
    ff = jnp.dot(x, w_ff1_ref[...],
                 preferred_element_type=jnp.float32) + b_ff1_ref[...]
    ff = _gelu(ff)
    ff = jnp.dot(ff, w_ff2_ref[...],
                 preferred_element_type=jnp.float32) + b_ff2_ref[...]
    x = _layernorm(x + ff, ln2_ref[...])

    # ---- LM head over caption positions (lane-dense 128-wide slab store) ----
    h_cap = x.reshape(b_tile, TOTAL_T, HIDDEN)[:, N_PATCHES:TOTAL_T, :]
    h_cap = h_cap.reshape(b_tile * CAP_LEN, HIDDEN)
    logits = jnp.dot(h_cap, w_vocab_ref[...],
                     preferred_element_type=jnp.float32) + b_vocab_ref[...]
    logits_ref[...] = logits.reshape(b_tile, CAP_LEN, VOCAB)


# ------------------------------ params + glue -------------------------------

def init_params(key):
    ks = jax.random.split(key, 10)
    s = 0.02

    def nrm(k, shape):
        return (s * jax.random.normal(k, shape)).astype(jnp.float32)

    def zeros(*shape):
        return jnp.zeros(shape, jnp.float32)

    def ln_params():
        return jnp.stack([jnp.ones((HIDDEN,), jnp.float32),
                          jnp.zeros((HIDDEN,), jnp.float32)])

    return {
        "patch_w": nrm(ks[0], (PATCH_DIM, HIDDEN)),
        "patch_b": zeros(1, HIDDEN),
        "word_emb": nrm(ks[1], (VOCAB, HIDDEN)),
        "pos_emb": nrm(ks[2], (TOTAL_T, HIDDEN)),
        "ln_emb": ln_params(),
        # q | k | v packed along the output (lane) axis -> one matmul.
        "w_qkv": jnp.concatenate([nrm(ks[3], (HIDDEN, HIDDEN)),
                                  nrm(ks[4], (HIDDEN, HIDDEN)),
                                  nrm(ks[5], (HIDDEN, HIDDEN))], axis=1),
        "b_qkv": zeros(1, 3 * HIDDEN),
        "wo": nrm(ks[6], (HIDDEN, HIDDEN)),
        "bo": zeros(1, HIDDEN),
        "ln1": ln_params(),
        "w_ff1": nrm(ks[7], (HIDDEN, FFN)),
        "b_ff1": zeros(1, FFN),
        "w_ff2": nrm(ks[8], (FFN, HIDDEN)),
        "b_ff2": zeros(1, HIDDEN),
        "ln2": ln_params(),
        "w_vocab": nrm(ks[9], (HIDDEN, VOCAB)),
        "b_vocab": zeros(1, VOCAB),
    }


def captioning_model_forward(params, images, captions, *, batch_tile=None):
    """images: NCHW float32 [B, 3, 16, 16]; captions: int32 [B, CAP_LEN].
    Returns (logits [B, CAP_LEN, VOCAB], None) — matching CaptioningModel.forward."""
    B = images.shape[0]
    if batch_tile is None:
        batch_tile = max(1, min(B, 8))       # fold up to 8 samples per grid step
    b_pad = pl.cdiv(B, batch_tile) * batch_tile

    # im2col patch extraction (pure layout) and the embedding-table gather stay
    # in XLA glue; everything else runs inside the single fused Pallas kernel.
    # TODO(synk): at real sizes move the gather in-kernel via
    # PrefetchScalarGridSpec + pl.Element row gather to avoid the cap_emb HBM
    # round trip.
    x = images.reshape(B, IMG_C, IMG_H // PATCH, PATCH, IMG_W // PATCH, PATCH)
    x = x.transpose(0, 2, 4, 1, 3, 5)                       # [B, h, w, C, P, P]
    patches = x.reshape(B, N_PATCHES, PATCH_DIM)            # [B, 16, 48]
    cap_emb = jnp.take(params["word_emb"], captions, axis=0)  # [B, L, HIDDEN]

    if b_pad != B:
        patches = jnp.pad(patches, ((0, b_pad - B), (0, 0), (0, 0)))
        cap_emb = jnp.pad(cap_emb, ((0, b_pad - B), (0, 0), (0, 0)))

    def idx_sample(b):      # per-batch-tile tensors
        return (b, 0, 0)

    def idx_weight(b):      # grid-invariant weights (stay resident in VMEM)
        return (0, 0)

    logits = pl.pallas_call(
        _fused_forward_kernel,
        out_shape=jax.ShapeDtypeStruct((b_pad, CAP_LEN, VOCAB), jnp.float32),
        grid=(b_pad // batch_tile,),
        in_specs=[
            pl.BlockSpec((batch_tile, N_PATCHES, PATCH_DIM), idx_sample),  # patches
            pl.BlockSpec((batch_tile, CAP_LEN, HIDDEN), idx_sample),       # cap_emb
            pl.BlockSpec((TOTAL_T, HIDDEN), idx_weight),                   # pos_emb
            pl.BlockSpec((PATCH_DIM, HIDDEN), idx_weight),                 # patch_w
            pl.BlockSpec((1, HIDDEN), idx_weight),                         # patch_b
            pl.BlockSpec((2, HIDDEN), idx_weight),                         # ln_emb
            pl.BlockSpec((HIDDEN, 3 * HIDDEN), idx_weight),                # w_qkv
            pl.BlockSpec((1, 3 * HIDDEN), idx_weight),                     # b_qkv
            pl.BlockSpec((HIDDEN, HIDDEN), idx_weight),                    # wo
            pl.BlockSpec((1, HIDDEN), idx_weight),                         # bo
            pl.BlockSpec((2, HIDDEN), idx_weight),                         # ln1
            pl.BlockSpec((HIDDEN, FFN), idx_weight),                       # w_ff1
            pl.BlockSpec((1, FFN), idx_weight),                            # b_ff1
            pl.BlockSpec((FFN, HIDDEN), idx_weight),                       # w_ff2
            pl.BlockSpec((1, HIDDEN), idx_weight),                         # b_ff2
            pl.BlockSpec((2, HIDDEN), idx_weight),                         # ln2
            pl.BlockSpec((HIDDEN, VOCAB), idx_weight),                     # w_vocab
            pl.BlockSpec((1, VOCAB), idx_weight),                          # b_vocab
        ],
        out_specs=pl.BlockSpec((batch_tile, CAP_LEN, VOCAB), idx_sample),
        compiler_params=pltpu.CompilerParams(
            dimension_semantics=("parallel",),
            vmem_limit_bytes=32 * 1024 * 1024),
    )(patches, cap_emb, params["pos_emb"],
      params["patch_w"], params["patch_b"], params["ln_emb"],
      params["w_qkv"], params["b_qkv"], params["wo"], params["bo"], params["ln1"],
      params["w_ff1"], params["b_ff1"], params["w_ff2"], params["b_ff2"], params["ln2"],
      params["w_vocab"], params["b_vocab"])

    if b_pad != B:
        logits = logits[:B]
    return logits, None


# ---------------------------------- main -----------------------------------

if __name__ == "__main__":
    key = jax.random.PRNGKey(0)
    k_params, k_img, k_cap = jax.random.split(key, 3)

    params = init_params(k_params)
    images = jax.random.normal(k_img, (2, IMG_C, IMG_H, IMG_W), dtype=jnp.float32)
    captions = jax.random.randint(k_cap, (2, CAP_LEN), 0, VOCAB, dtype=jnp.int32)

    logits, _ = jax.jit(captioning_model_forward)(params, images, captions)
    jax.block_until_ready(logits)

    assert logits.shape == (2, CAP_LEN, VOCAB)
    assert logits.dtype == jnp.float32
    print("KERNEL_OK")
</pallas_src>

<mosaic_0001>
module attributes {stable_mosaic.version = 11 : i64} {
  func.func @_fused_forward_kernel(%arg0: i32, %arg1: memref<2x16x48xf32, #tpu.memory_space<vmem>>, %arg2: memref<2x8x32xf32, #tpu.memory_space<vmem>>, %arg3: memref<24x32xf32, #tpu.memory_space<vmem>>, %arg4: memref<48x32xf32, #tpu.memory_space<vmem>>, %arg5: memref<1x32xf32, #tpu.memory_space<vmem>>, %arg6: memref<2x32xf32, #tpu.memory_space<vmem>>, %arg7: memref<32x96xf32, #tpu.memory_space<vmem>>, %arg8: memref<1x96xf32, #tpu.memory_space<vmem>>, %arg9: memref<32x32xf32, #tpu.memory_space<vmem>>, %arg10: memref<1x32xf32, #tpu.memory_space<vmem>>, %arg11: memref<2x32xf32, #tpu.memory_space<vmem>>, %arg12: memref<32x64xf32, #tpu.memory_space<vmem>>, %arg13: memref<1x64xf32, #tpu.memory_space<vmem>>, %arg14: memref<64x32xf32, #tpu.memory_space<vmem>>, %arg15: memref<1x32xf32, #tpu.memory_space<vmem>>, %arg16: memref<2x32xf32, #tpu.memory_space<vmem>>, %arg17: memref<32x128xf32, #tpu.memory_space<vmem>>, %arg18: memref<1x128xf32, #tpu.memory_space<vmem>>, %arg19: memref<2x8x128xf32, #tpu.memory_space<vmem>>) attributes {dimension_semantics = [#tpu.dimension_semantics<parallel>], iteration_bounds = array<i64: 1>, scalar_prefetch = 0 : i64, scratch_operands = 0 : i64, tpu.core_type = #tpu.core_type<tc>, window_params = [{transform_indices = @transform_0, window_bounds = array<i64: 2, 16, 48>}, {transform_indices = @transform_1, window_bounds = array<i64: 2, 8, 32>}, {pipeline_mode = #tpu.pipeline_mode<synchronous>, transform_indices = @transform_2, window_bounds = array<i64: 24, 32>}, {pipeline_mode = #tpu.pipeline_mode<synchronous>, transform_indices = @transform_3, window_bounds = array<i64: 48, 32>}, {pipeline_mode = #tpu.pipeline_mode<synchronous>, transform_indices = @transform_4, window_bounds = array<i64: 1, 32>}, {pipeline_mode = #tpu.pipeline_mode<synchronous>, transform_indices = @transform_5, window_bounds = array<i64: 2, 32>}, {pipeline_mode = #tpu.pipeline_mode<synchronous>, transform_indices = @transform_6, window_bounds = array<i64: 32, 96>}, {pipeline_mode = #tpu.pipeline_mode<synchronous>, transform_indices = @transform_7, window_bounds = array<i64: 1, 96>}, {pipeline_mode = #tpu.pipeline_mode<synchronous>, transform_indices = @transform_8, window_bounds = array<i64: 32, 32>}, {pipeline_mode = #tpu.pipeline_mode<synchronous>, transform_indices = @transform_9, window_bounds = array<i64: 1, 32>}, {pipeline_mode = #tpu.pipeline_mode<synchronous>, transform_indices = @transform_10, window_bounds = array<i64: 2, 32>}, {pipeline_mode = #tpu.pipeline_mode<synchronous>, transform_indices = @transform_11, window_bounds = array<i64: 32, 64>}, {pipeline_mode = #tpu.pipeline_mode<synchronous>, transform_indices = @transform_12, window_bounds = array<i64: 1, 64>}, {pipeline_mode = #tpu.pipeline_mode<synchronous>, transform_indices = @transform_13, window_bounds = array<i64: 64, 32>}, {pipeline_mode = #tpu.pipeline_mode<synchronous>, transform_indices = @transform_14, window_bounds = array<i64: 1, 32>}, {pipeline_mode = #tpu.pipeline_mode<synchronous>, transform_indices = @transform_15, window_bounds = array<i64: 2, 32>}, {pipeline_mode = #tpu.pipeline_mode<synchronous>, transform_indices = @transform_16, window_bounds = array<i64: 32, 128>}, {pipeline_mode = #tpu.pipeline_mode<synchronous>, transform_indices = @transform_17, window_bounds = array<i64: 1, 128>}, {transform_indices = @transform_18, window_bounds = array<i64: 2, 8, 128>}]} {
    %c0 = arith.constant 0 : index
    %c0_0 = arith.constant 0 : index
    %c0_1 = arith.constant 0 : index
    %0 = vector.load %arg1[%c0, %c0_0, %c0_1] : memref<2x16x48xf32, #tpu.memory_space<vmem>>, vector<2x16x48xf32>
    %1 = vector.shape_cast %0 : vector<2x16x48xf32> to vector<32x48xf32>
    %c0_2 = arith.constant 0 : index
    %c0_3 = arith.constant 0 : index
    %2 = vector.load %arg4[%c0_2, %c0_3] : memref<48x32xf32, #tpu.memory_space<vmem>>, vector<48x32xf32>
    %cst = arith.constant dense<0.000000e+00> : vector<32x32xf32>
    %3 = tpu.matmul %1, %2, %cst {dimension_numbers = #tpu.dot_dimension_numbers<[1], [0], [0], [1], [0, 0, 1, 1], [], []>} : vector<32x48xf32>, vector<48x32xf32>, vector<32x32xf32> -> vector<32x32xf32>
    %c0_4 = arith.constant 0 : index
    %c0_5 = arith.constant 0 : index
    %4 = vector.load %arg5[%c0_4, %c0_5] : memref<1x32xf32, #tpu.memory_space<vmem>>, vector<1x32xf32>
    %5 = vector.broadcast %4 : vector<1x32xf32> to vector<32x32xf32>
    %6 = arith.addf %3, %5 : vector<32x32xf32>
    %7 = vector.shape_cast %6 : vector<32x32xf32> to vector<2x16x32xf32>
    %c0_6 = arith.constant 0 : index
    %c0_7 = arith.constant 0 : index
    %c0_8 = arith.constant 0 : index
    %8 = vector.load %arg2[%c0_6, %c0_7, %c0_8] : memref<2x8x32xf32, #tpu.memory_space<vmem>>, vector<2x8x32xf32>
    %9 = tpu.concatenate %7, %8 in 1 : vector<2x16x32xf32>, vector<2x8x32xf32> -> vector<2x24x32xf32>
    %c0_9 = arith.constant 0 : index
    %c0_10 = arith.constant 0 : index
    %10 = vector.load %arg3[%c0_9, %c0_10] : memref<24x32xf32, #tpu.memory_space<vmem>>, vector<24x32xf32>
    %11 = vector.shape_cast %10 : vector<24x32xf32> to vector<1x24x32xf32>
    %12 = vector.broadcast %11 : vector<1x24x32xf32> to vector<2x24x32xf32>
    %13 = arith.addf %9, %12 : vector<2x24x32xf32>
    %c0_11 = arith.constant 0 : index
    %c0_12 = arith.constant 0 : index
    %14 = vector.load %arg6[%c0_11, %c0_12] : memref<2x32xf32, #tpu.memory_space<vmem>>, vector<2x32xf32>
    %cst_13 = arith.constant dense<0.000000e+00> : vector<2x24xf32>
    %15 = vector.multi_reduction <add>, %13, %cst_13 [2] : vector<2x24x32xf32> to vector<2x24xf32>
    %16 = vector.shape_cast %15 : vector<2x24xf32> to vector<2x24x1xf32>
    %cst_14 = arith.constant 3.200000e+01 : f32
    %17 = vector.broadcast %cst_14 : f32 to vector<2x24x1xf32>
    %18 = arith.divf %16, %17 : vector<2x24x1xf32>
    %19 = vector.broadcast %18 : vector<2x24x1xf32> to vector<2x24x32xf32>
    %20 = arith.subf %13, %19 : vector<2x24x32xf32>
    %21 = arith.mulf %20, %20 : vector<2x24x32xf32>
    %cst_15 = arith.constant dense<0.000000e+00> : vector<2x24xf32>
    %22 = vector.multi_reduction <add>, %21, %cst_15 [2] : vector<2x24x32xf32> to vector<2x24xf32>
    %23 = vector.shape_cast %22 : vector<2x24xf32> to vector<2x24x1xf32>
    %cst_16 = arith.constant 3.200000e+01 : f32
    %24 = vector.broadcast %cst_16 : f32 to vector<2x24x1xf32>
    %25 = arith.divf %23, %24 : vector<2x24x1xf32>
    %cst_17 = arith.constant 9.99999996E-13 : f32
    %26 = vector.broadcast %cst_17 : f32 to vector<2x24x1xf32>
    %27 = arith.addf %25, %26 : vector<2x24x1xf32>
    %28 = math.rsqrt %27 : vector<2x24x1xf32>
    %29 = vector.broadcast %28 : vector<2x24x1xf32> to vector<2x24x32xf32>
    %30 = arith.mulf %20, %29 : vector<2x24x32xf32>
    %31 = vector.extract_strided_slice %14 {offsets = [0, 0], sizes = [1, 32], strides = [1, 1]} : vector<2x32xf32> to vector<1x32xf32>
    %32 = vector.shape_cast %31 : vector<1x32xf32> to vector<1x1x32xf32>
    %33 = vector.broadcast %32 : vector<1x1x32xf32> to vector<2x24x32xf32>
    %34 = arith.mulf %30, %33 : vector<2x24x32xf32>
    %35 = vector.extract_strided_slice %14 {offsets = [1, 0], sizes = [1, 32], strides = [1, 1]} : vector<2x32xf32> to vector<1x32xf32>
    %36 = vector.shape_cast %35 : vector<1x32xf32> to vector<1x1x32xf32>
    %37 = vector.broadcast %36 : vector<1x1x32xf32> to vector<2x24x32xf32>
    %38 = arith.addf %34, %37 : vector<2x24x32xf32>
    %39 = vector.shape_cast %38 : vector<2x24x32xf32> to vector<48x32xf32>
    %c0_18 = arith.constant 0 : index
    %c0_19 = arith.constant 0 : index
    %40 = vector.load %arg7[%c0_18, %c0_19] : memref<32x96xf32, #tpu.memory_space<vmem>>, vector<32x96xf32>
    %cst_20 = arith.constant dense<0.000000e+00> : vector<48x96xf32>
    %41 = tpu.matmul %39, %40, %cst_20 {dimension_numbers = #tpu.dot_dimension_numbers<[1], [0], [0], [1], [0, 0, 1, 1], [], []>} : vector<48x32xf32>, vector<32x96xf32>, vector<48x96xf32> -> vector<48x96xf32>
    %c0_21 = arith.constant 0 : index
    %c0_22 = arith.constant 0 : index
    %42 = vector.load %arg8[%c0_21, %c0_22] : memref<1x96xf32, #tpu.memory_space<vmem>>, vector<1x96xf32>
    %43 = vector.broadcast %42 : vector<1x96xf32> to vector<48x96xf32>
    %44 = arith.addf %41, %43 : vector<48x96xf32>
    %45 = vector.shape_cast %44 : vector<48x96xf32> to vector<2x24x96xf32>
    %46 = vector.extract_strided_slice %45 {offsets = [0, 0, 0], sizes = [2, 24, 8], strides = [1, 1, 1]} : vector<2x24x96xf32> to vector<2x24x8xf32>
    %47 = vector.extract_strided_slice %45 {offsets = [0, 0, 32], sizes = [2, 24, 8], strides = [1, 1, 1]} : vector<2x24x96xf32> to vector<2x24x8xf32>
    %48 = vector.extract_strided_slice %45 {offsets = [0, 0, 64], sizes = [2, 24, 8], strides = [1, 1, 1]} : vector<2x24x96xf32> to vector<2x24x8xf32>
    "tpu.trace_start"() <{level = 10 : i32, message = "bqd,bkd->bqk"}> : () -> ()
    %cst_23 = arith.constant dense<0.000000e+00> : vector<2x24x24xf32>
    %49 = tpu.matmul %46, %47, %cst_23 {dimension_numbers = #tpu.dot_dimension_numbers<[2], [2], [1], [1], [0, 0, 0, 1, 1, 1], [0], [0]>} : vector<2x24x8xf32>, vector<2x24x8xf32>, vector<2x24x24xf32> -> vector<2x24x24xf32>
    "tpu.trace_stop"() : () -> ()
    %cst_24 = arith.constant 0.353553385 : f32
    %50 = vector.broadcast %cst_24 : f32 to vector<2x24x24xf32>
    %51 = arith.mulf %49, %50 : vector<2x24x24xf32>
    %cst_25 = arith.constant dense<0xFF800000> : vector<2x24xf32>
    %52 = vector.multi_reduction <maximumf>, %51, %cst_25 [2] : vector<2x24x24xf32> to vector<2x24xf32>
    %53 = vector.shape_cast %52 : vector<2x24xf32> to vector<2x24x1xf32>
    %54 = vector.broadcast %53 : vector<2x24x1xf32> to vector<2x24x24xf32>
    %55 = arith.subf %51, %54 : vector<2x24x24xf32>
    %56 = math.exp %55 : vector<2x24x24xf32>
    %cst_26 = arith.constant dense<0.000000e+00> : vector<2x24xf32>
    %57 = vector.multi_reduction <add>, %56, %cst_26 [2] : vector<2x24x24xf32> to vector<2x24xf32>
    %58 = vector.shape_cast %57 : vector<2x24xf32> to vector<2x24x1xf32>
    %59 = tpu.reciprocal %58 {approx = true} : vector<2x24x1xf32> -> vector<2x24x1xf32>
    %60 = vector.broadcast %59 : vector<2x24x1xf32> to vector<2x24x24xf32>
    %61 = arith.mulf %56, %60 : vector<2x24x24xf32>
    "tpu.trace_start"() <{level = 10 : i32, message = "bqk,bkd->bqd"}> : () -> ()
    %cst_27 = arith.constant dense<0.000000e+00> : vector<2x24x8xf32>
    %62 = tpu.matmul %61, %48, %cst_27 {dimension_numbers = #tpu.dot_dimension_numbers<[2], [1], [1], [2], [0, 0, 0, 1, 1, 2], [0], [0]>} : vector<2x24x24xf32>, vector<2x24x8xf32>, vector<2x24x8xf32> -> vector<2x24x8xf32>
    "tpu.trace_stop"() : () -> ()
    %63 = vector.extract_strided_slice %45 {offsets = [0, 0, 8], sizes = [2, 24, 8], strides = [1, 1, 1]} : vector<2x24x96xf32> to vector<2x24x8xf32>
    %64 = vector.extract_strided_slice %45 {offsets = [0, 0, 40], sizes = [2, 24, 8], strides = [1, 1, 1]} : vector<2x24x96xf32> to vector<2x24x8xf32>
    %65 = vector.extract_strided_slice %45 {offsets = [0, 0, 72], sizes = [2, 24, 8], strides = [1, 1, 1]} : vector<2x24x96xf32> to vector<2x24x8xf32>
    "tpu.trace_start"() <{level = 10 : i32, message = "bqd,bkd->bqk"}> : () -> ()
    %cst_28 = arith.constant dense<0.000000e+00> : vector<2x24x24xf32>
    %66 = tpu.matmul %63, %64, %cst_28 {dimension_numbers = #tpu.dot_dimension_numbers<[2], [2], [1], [1], [0, 0, 0, 1, 1, 1], [0], [0]>} : vector<2x24x8xf32>, vector<2x24x8xf32>, vector<2x24x24xf32> -> vector<2x24x24xf32>
    "tpu.trace_stop"() : () -> ()
    %cst_29 = arith.constant 0.353553385 : f32
    %67 = vector.broadcast %cst_29 : f32 to vector<2x24x24xf32>
    %68 = arith.mulf %66, %67 : vector<2x24x24xf32>
    %cst_30 = arith.constant dense<0xFF800000> : vector<2x24xf32>
    %69 = vector.multi_reduction <maximumf>, %68, %cst_30 [2] : vector<2x24x24xf32> to vector<2x24xf32>
    %70 = vector.shape_cast %69 : vector<2x24xf32> to vector<2x24x1xf32>
    %71 = vector.broadcast %70 : vector<2x24x1xf32> to vector<2x24x24xf32>
    %72 = arith.subf %68, %71 : vector<2x24x24xf32>
    %73 = math.exp %72 : vector<2x24x24xf32>
    %cst_31 = arith.constant dense<0.000000e+00> : vector<2x24xf32>
    %74 = vector.multi_reduction <add>, %73, %cst_31 [2] : vector<2x24x24xf32> to vector<2x24xf32>
    %75 = vector.shape_cast %74 : vector<2x24xf32> to vector<2x24x1xf32>
    %76 = tpu.reciprocal %75 {approx = true} : vector<2x24x1xf32> -> vector<2x24x1xf32>
    %77 = vector.broadcast %76 : vector<2x24x1xf32> to vector<2x24x24xf32>
    %78 = arith.mulf %73, %77 : vector<2x24x24xf32>
    "tpu.trace_start"() <{level = 10 : i32, message = "bqk,bkd->bqd"}> : () -> ()
    %cst_32 = arith.constant dense<0.000000e+00> : vector<2x24x8xf32>
    %79 = tpu.matmul %78, %65, %cst_32 {dimension_numbers = #tpu.dot_dimension_numbers<[2], [1], [1], [2], [0, 0, 0, 1, 1, 2], [0], [0]>} : vector<2x24x24xf32>, vector<2x24x8xf32>, vector<2x24x8xf32> -> vector<2x24x8xf32>
    "tpu.trace_stop"() : () -> ()
    %80 = vector.extract_strided_slice %45 {offsets = [0, 0, 16], sizes = [2, 24, 8], strides = [1, 1, 1]} : vector<2x24x96xf32> to vector<2x24x8xf32>
    %81 = vector.extract_strided_slice %45 {offsets = [0, 0, 48], sizes = [2, 24, 8], strides = [1, 1, 1]} : vector<2x24x96xf32> to vector<2x24x8xf32>
    %82 = vector.extract_strided_slice %45 {offsets = [0, 0, 80], sizes = [2, 24, 8], strides = [1, 1, 1]} : vector<2x24x96xf32> to vector<2x24x8xf32>
    "tpu.trace_start"() <{level = 10 : i32, message = "bqd,bkd->bqk"}> : () -> ()
    %cst_33 = arith.constant dense<0.000000e+00> : vector<2x24x24xf32>
    %83 = tpu.matmul %80, %81, %cst_33 {dimension_numbers = #tpu.dot_dimension_numbers<[2], [2], [1], [1], [0, 0, 0, 1, 1, 1], [0], [0]>} : vector<2x24x8xf32>, vector<2x24x8xf32>, vector<2x24x24xf32> -> vector<2x24x24xf32>
    "tpu.trace_stop"() : () -> ()
    %cst_34 = arith.constant 0.353553385 : f32
    %84 = vector.broadcast %cst_34 : f32 to vector<2x24x24xf32>
    %85 = arith.mulf %83, %84 : vector<2x24x24xf32>
    %cst_35 = arith.constant dense<0xFF800000> : vector<2x24xf32>
    %86 = vector.multi_reduction <maximumf>, %85, %cst_35 [2] : vector<2x24x24xf32> to vector<2x24xf32>
    %87 = vector.shape_cast %86 : vector<2x24xf32> to vector<2x24x1xf32>
    %88 = vector.broadcast %87 : vector<2x24x1xf32> to vector<2x24x24xf32>
    %89 = arith.subf %85, %88 : vector<2x24x24xf32>
    %90 = math.exp %89 : vector<2x24x24xf32>
    %cst_36 = arith.constant dense<0.000000e+00> : vector<2x24xf32>
    %91 = vector.multi_reduction <add>, %90, %cst_36 [2] : vector<2x24x24xf32> to vector<2x24xf32>
    %92 = vector.shape_cast %91 : vector<2x24xf32> to vector<2x24x1xf32>
    %93 = tpu.reciprocal %92 {approx = true} : vector<2x24x1xf32> -> vector<2x24x1xf32>
    %94 = vector.broadcast %93 : vector<2x24x1xf32> to vector<2x24x24xf32>
    %95 = arith.mulf %90, %94 : vector<2x24x24xf32>
    "tpu.trace_start"() <{level = 10 : i32, message = "bqk,bkd->bqd"}> : () -> ()
    %cst_37 = arith.constant dense<0.000000e+00> : vector<2x24x8xf32>
    %96 = tpu.matmul %95, %82, %cst_37 {dimension_numbers = #tpu.dot_dimension_numbers<[2], [1], [1], [2], [0, 0, 0, 1, 1, 2], [0], [0]>} : vector<2x24x24xf32>, vector<2x24x8xf32>, vector<2x24x8xf32> -> vector<2x24x8xf32>
    "tpu.trace_stop"() : () -> ()
    %97 = vector.extract_strided_slice %45 {offsets = [0, 0, 24], sizes = [2, 24, 8], strides = [1, 1, 1]} : vector<2x24x96xf32> to vector<2x24x8xf32>
    %98 = vector.extract_strided_slice %45 {offsets = [0, 0, 56], sizes = [2, 24, 8], strides = [1, 1, 1]} : vector<2x24x96xf32> to vector<2x24x8xf32>
    %99 = vector.extract_strided_slice %45 {offsets = [0, 0, 88], sizes = [2, 24, 8], strides = [1, 1, 1]} : vector<2x24x96xf32> to vector<2x24x8xf32>
    "tpu.trace_start"() <{level = 10 : i32, message = "bqd,bkd->bqk"}> : () -> ()
    %cst_38 = arith.constant dense<0.000000e+00> : vector<2x24x24xf32>
    %100 = tpu.matmul %97, %98, %cst_38 {dimension_numbers = #tpu.dot_dimension_numbers<[2], [2], [1], [1], [0, 0, 0, 1, 1, 1], [0], [0]>} : vector<2x24x8xf32>, vector<2x24x8xf32>, vector<2x24x24xf32> -> vector<2x24x24xf32>
    "tpu.trace_stop"() : () -> ()
    %cst_39 = arith.constant 0.353553385 : f32
    %101 = vector.broadcast %cst_39 : f32 to vector<2x24x24xf32>
    %102 = arith.mulf %100, %101 : vector<2x24x24xf32>
    %cst_40 = arith.constant dense<0xFF800000> : vector<2x24xf32>
    %103 = vector.multi_reduction <maximumf>, %102, %cst_40 [2] : vector<2x24x24xf32> to vector<2x24xf32>
    %104 = vector.shape_cast %103 : vector<2x24xf32> to vector<2x24x1xf32>
    %105 = vector.broadcast %104 : vector<2x24x1xf32> to vector<2x24x24xf32>
    %106 = arith.subf %102, %105 : vector<2x24x24xf32>
    %107 = math.exp %106 : vector<2x24x24xf32>
    %cst_41 = arith.constant dense<0.000000e+00> : vector<2x24xf32>
    %108 = vector.multi_reduction <add>, %107, %cst_41 [2] : vector<2x24x24xf32> to vector<2x24xf32>
    %109 = vector.shape_cast %108 : vector<2x24xf32> to vector<2x24x1xf32>
    %110 = tpu.reciprocal %109 {approx = true} : vector<2x24x1xf32> -> vector<2x24x1xf32>
    %111 = vector.broadcast %110 : vector<2x24x1xf32> to vector<2x24x24xf32>
    %112 = arith.mulf %107, %111 : vector<2x24x24xf32>
    "tpu.trace_start"() <{level = 10 : i32, message = "bqk,bkd->bqd"}> : () -> ()
    %cst_42 = arith.constant dense<0.000000e+00> : vector<2x24x8xf32>
    %113 = tpu.matmul %112, %99, %cst_42 {dimension_numbers = #tpu.dot_dimension_numbers<[2], [1], [1], [2], [0, 0, 0, 1, 1, 2], [0], [0]>} : vector<2x24x24xf32>, vector<2x24x8xf32>, vector<2x24x8xf32> -> vector<2x24x8xf32>
    "tpu.trace_stop"() : () -> ()
    %114 = tpu.concatenate %62, %79, %96, %113 in 2 : vector<2x24x8xf32>, vector<2x24x8xf32>, vector<2x24x8xf32>, vector<2x24x8xf32> -> vector<2x24x32xf32>
    %115 = vector.shape_cast %114 : vector<2x24x32xf32> to vector<48x32xf32>
    %c0_43 = arith.constant 0 : index
    %c0_44 = arith.constant 0 : index
    %116 = vector.load %arg9[%c0_43, %c0_44] : memref<32x32xf32, #tpu.memory_space<vmem>>, vector<32x32xf32>
    %cst_45 = arith.constant dense<0.000000e+00> : vector<48x32xf32>
    %117 = tpu.matmul %115, %116, %cst_45 {dimension_numbers = #tpu.dot_dimension_numbers<[1], [0], [0], [1], [0, 0, 1, 1], [], []>} : vector<48x32xf32>, vector<32x32xf32>, vector<48x32xf32> -> vector<48x32xf32>
    %c0_46 = arith.constant 0 : index
    %c0_47 = arith.constant 0 : index
    %118 = vector.load %arg10[%c0_46, %c0_47] : memref<1x32xf32, #tpu.memory_space<vmem>>, vector<1x32xf32>
    %119 = vector.broadcast %118 : vector<1x32xf32> to vector<48x32xf32>
    %120 = arith.addf %117, %119 : vector<48x32xf32>
    %121 = arith.addf %39, %120 : vector<48x32xf32>
    %c0_48 = arith.constant 0 : index
    %c0_49 = arith.constant 0 : index
    %122 = vector.load %arg11[%c0_48, %c0_49] : memref<2x32xf32, #tpu.memory_space<vmem>>, vector<2x32xf32>
    %cst_50 = arith.constant dense<0.000000e+00> : vector<48xf32>
    %123 = vector.multi_reduction <add>, %121, %cst_50 [1] : vector<48x32xf32> to vector<48xf32>
    %124 = vector.shape_cast %123 : vector<48xf32> to vector<48x1xf32>
    %cst_51 = arith.constant 3.200000e+01 : f32
    %125 = vector.broadcast %cst_51 : f32 to vector<48x1xf32>
    %126 = arith.divf %124, %125 : vector<48x1xf32>
    %127 = vector.broadcast %126 : vector<48x1xf32> to vector<48x32xf32>
    %128 = arith.subf %121, %127 : vector<48x32xf32>
    %129 = arith.mulf %128, %128 : vector<48x32xf32>
    %cst_52 = arith.constant dense<0.000000e+00> : vector<48xf32>
    %130 = vector.multi_reduction <add>, %129, %cst_52 [1] : vector<48x32xf32> to vector<48xf32>
    %131 = vector.shape_cast %130 : vector<48xf32> to vector<48x1xf32>
    %cst_53 = arith.constant 3.200000e+01 : f32
    %132 = vector.broadcast %cst_53 : f32 to vector<48x1xf32>
    %133 = arith.divf %131, %132 : vector<48x1xf32>
    %cst_54 = arith.constant 9.99999996E-13 : f32
    %134 = vector.broadcast %cst_54 : f32 to vector<48x1xf32>
    %135 = arith.addf %133, %134 : vector<48x1xf32>
    %136 = math.rsqrt %135 : vector<48x1xf32>
    %137 = vector.broadcast %136 : vector<48x1xf32> to vector<48x32xf32>
    %138 = arith.mulf %128, %137 : vector<48x32xf32>
    %139 = vector.extract_strided_slice %122 {offsets = [0, 0], sizes = [1, 32], strides = [1, 1]} : vector<2x32xf32> to vector<1x32xf32>
    %140 = vector.broadcast %139 : vector<1x32xf32> to vector<48x32xf32>
    %141 = arith.mulf %138, %140 : vector<48x32xf32>
    %142 = vector.extract_strided_slice %122 {offsets = [1, 0], sizes = [1, 32], strides = [1, 1]} : vector<2x32xf32> to vector<1x32xf32>
    %143 = vector.broadcast %142 : vector<1x32xf32> to vector<48x32xf32>
    %144 = arith.addf %141, %143 : vector<48x32xf32>
    %c0_55 = arith.constant 0 : index
    %c0_56 = arith.constant 0 : index
    %145 = vector.load %arg12[%c0_55, %c0_56] : memref<32x64xf32, #tpu.memory_space<vmem>>, vector<32x64xf32>
    %cst_57 = arith.constant dense<0.000000e+00> : vector<48x64xf32>
    %146 = tpu.matmul %144, %145, %cst_57 {dimension_numbers = #tpu.dot_dimension_numbers<[1], [0], [0], [1], [0, 0, 1, 1], [], []>} : vector<48x32xf32>, vector<32x64xf32>, vector<48x64xf32> -> vector<48x64xf32>
    %c0_58 = arith.constant 0 : index
    %c0_59 = arith.constant 0 : index
    %147 = vector.load %arg13[%c0_58, %c0_59] : memref<1x64xf32, #tpu.memory_space<vmem>>, vector<1x64xf32>
    %148 = vector.broadcast %147 : vector<1x64xf32> to vector<48x64xf32>
    %149 = arith.addf %146, %148 : vector<48x64xf32>
    %150 = arith.mulf %149, %149 : vector<48x64xf32>
    %151 = arith.mulf %149, %150 : vector<48x64xf32>
    %cst_60 = arith.constant 4.471500e-02 : f32
    %152 = vector.broadcast %cst_60 : f32 to vector<48x64xf32>
    %153 = arith.mulf %152, %151 : vector<48x64xf32>
    %154 = arith.addf %149, %153 : vector<48x64xf32>
    %cst_61 = arith.constant 0.797884583 : f32
    %155 = vector.broadcast %cst_61 : f32 to vector<48x64xf32>
    %156 = arith.mulf %155, %154 : vector<48x64xf32>
    %157 = math.tanh %156 : vector<48x64xf32>
    %cst_62 = arith.constant 1.000000e+00 : f32
    %158 = vector.broadcast %cst_62 : f32 to vector<48x64xf32>
    %159 = arith.addf %158, %157 : vector<48x64xf32>
    %cst_63 = arith.constant 5.000000e-01 : f32
    %160 = vector.broadcast %cst_63 : f32 to vector<48x64xf32>
    %161 = arith.mulf %160, %159 : vector<48x64xf32>
    %162 = arith.mulf %149, %161 : vector<48x64xf32>
    %c0_64 = arith.constant 0 : index
    %c0_65 = arith.constant 0 : index
    %163 = vector.load %arg14[%c0_64, %c0_65] : memref<64x32xf32, #tpu.memory_space<vmem>>, vector<64x32xf32>
    %cst_66 = arith.constant dense<0.000000e+00> : vector<48x32xf32>
    %164 = tpu.matmul %162, %163, %cst_66 {dimension_numbers = #tpu.dot_dimension_numbers<[1], [0], [0], [1], [0, 0, 1, 1], [], []>} : vector<48x64xf32>, vector<64x32xf32>, vector<48x32xf32> -> vector<48x32xf32>
    %c0_67 = arith.constant 0 : index
    %c0_68 = arith.constant 0 : index
    %165 = vector.load %arg15[%c0_67, %c0_68] : memref<1x32xf32, #tpu.memory_space<vmem>>, vector<1x32xf32>
    %166 = vector.broadcast %165 : vector<1x32xf32> to vector<48x32xf32>
    %167 = arith.addf %164, %166 : vector<48x32xf32>
    %168 = arith.addf %144, %167 : vector<48x32xf32>
    %c0_69 = arith.constant 0 : index
    %c0_70 = arith.constant 0 : index
    %169 = vector.load %arg16[%c0_69, %c0_70] : memref<2x32xf32, #tpu.memory_space<vmem>>, vector<2x32xf32>
    %cst_71 = arith.constant dense<0.000000e+00> : vector<48xf32>
    %170 = vector.multi_reduction <add>, %168, %cst_71 [1] : vector<48x32xf32> to vector<48xf32>
    %171 = vector.shape_cast %170 : vector<48xf32> to vector<48x1xf32>
    %cst_72 = arith.constant 3.200000e+01 : f32
    %172 = vector.broadcast %cst_72 : f32 to vector<48x1xf32>
    %173 = arith.divf %171, %172 : vector<48x1xf32>
    %174 = vector.broadcast %173 : vector<48x1xf32> to vector<48x32xf32>
    %175 = arith.subf %168, %174 : vector<48x32xf32>
    %176 = arith.mulf %175, %175 : vector<48x32xf32>
    %cst_73 = arith.constant dense<0.000000e+00> : vector<48xf32>
    %177 = vector.multi_reduction <add>, %176, %cst_73 [1] : vector<48x32xf32> to vector<48xf32>
    %178 = vector.shape_cast %177 : vector<48xf32> to vector<48x1xf32>
    %cst_74 = arith.constant 3.200000e+01 : f32
    %179 = vector.broadcast %cst_74 : f32 to vector<48x1xf32>
    %180 = arith.divf %178, %179 : vector<48x1xf32>
    %cst_75 = arith.constant 9.99999996E-13 : f32
    %181 = vector.broadcast %cst_75 : f32 to vector<48x1xf32>
    %182 = arith.addf %180, %181 : vector<48x1xf32>
    %183 = math.rsqrt %182 : vector<48x1xf32>
    %184 = vector.broadcast %183 : vector<48x1xf32> to vector<48x32xf32>
    %185 = arith.mulf %175, %184 : vector<48x32xf32>
    %186 = vector.extract_strided_slice %169 {offsets = [0, 0], sizes = [1, 32], strides = [1, 1]} : vector<2x32xf32> to vector<1x32xf32>
    %187 = vector.broadcast %186 : vector<1x32xf32> to vector<48x32xf32>
    %188 = arith.mulf %185, %187 : vector<48x32xf32>
    %189 = vector.extract_strided_slice %169 {offsets = [1, 0], sizes = [1, 32], strides = [1, 1]} : vector<2x32xf32> to vector<1x32xf32>
    %190 = vector.broadcast %189 : vector<1x32xf32> to vector<48x32xf32>
    %191 = arith.addf %188, %190 : vector<48x32xf32>
    %192 = vector.shape_cast %191 : vector<48x32xf32> to vector<2x24x32xf32>
    %193 = vector.extract_strided_slice %192 {offsets = [0, 16, 0], sizes = [2, 8, 32], strides = [1, 1, 1]} : vector<2x24x32xf32> to vector<2x8x32xf32>
    %194 = vector.shape_cast %193 : vector<2x8x32xf32> to vector<16x32xf32>
    %c0_76 = arith.constant 0 : index
    %c0_77 = arith.constant 0 : index
    %195 = vector.load %arg17[%c0_76, %c0_77] : memref<32x128xf32, #tpu.memory_space<vmem>>, vector<32x128xf32>
    %cst_78 = arith.constant dense<0.000000e+00> : vector<16x128xf32>
    %196 = tpu.matmul %194, %195, %cst_78 {dimension_numbers = #tpu.dot_dimension_numbers<[1], [0], [0], [1], [0, 0, 1, 1], [], []>} : vector<16x32xf32>, vector<32x128xf32>, vector<16x128xf32> -> vector<16x128xf32>
    %c0_79 = arith.constant 0 : index
    %c0_80 = arith.constant 0 : index
    %197 = vector.load %arg18[%c0_79, %c0_80] : memref<1x128xf32, #tpu.memory_space<vmem>>, vector<1x128xf32>
    %198 = vector.broadcast %197 : vector<1x128xf32> to vector<16x128xf32>
    %199 = arith.addf %196, %198 : vector<16x128xf32>
    %200 = vector.shape_cast %199 : vector<16x128xf32> to vector<2x8x128xf32>
    %c0_81 = arith.constant 0 : index
    %c0_82 = arith.constant 0 : index
    %c0_83 = arith.constant 0 : index
    %201 = vector.load %arg19[%c0_81, %c0_82, %c0_83] : memref<2x8x128xf32, #tpu.memory_space<vmem>>, vector<2x8x128xf32>
    tpu.vector_store %arg19[%c0_81, %c0_82, %c0_83], %200 {strides = array<i32>} : memref<2x8x128xf32, #tpu.memory_space<vmem>>, vector<2x8x128xf32>,
    return
  }
  func.func @transform_0(%arg0: i32) -> (i32, i32, i32) {
    %c0_i32 = arith.constant 0 : i32
    %c0_i32_0 = arith.constant 0 : i32
    %c0_i32_1 = arith.constant 0 : i32
    return %arg0, %c0_i32, %c0_i32_0 : i32, i32, i32
  }
  func.func @transform_1(%arg0: i32) -> (i32, i32, i32) {
    %c0_i32 = arith.constant 0 : i32
    %c0_i32_0 = arith.constant 0 : i32
    %c0_i32_1 = arith.constant 0 : i32
    return %arg0, %c0_i32, %c0_i32_0 : i32, i32, i32
  }
  func.func @transform_2(%arg0: i32) -> (i32, i32) {
    %c0_i32 = arith.constant 0 : i32
    %c0_i32_0 = arith.constant 0 : i32
    %c0_i32_1 = arith.constant 0 : i32
    return %c0_i32, %c0_i32_0 : i32, i32
  }
  func.func @transform_3(%arg0: i32) -> (i32, i32) {
    %c0_i32 = arith.constant 0 : i32
    %c0_i32_0 = arith.constant 0 : i32
    %c0_i32_1 = arith.constant 0 : i32
    return %c0_i32, %c0_i32_0 : i32, i32
  }
  func.func @transform_4(%arg0: i32) -> (i32, i32) {
    %c0_i32 = arith.constant 0 : i32
    %c0_i32_0 = arith.constant 0 : i32
    %c0_i32_1 = arith.constant 0 : i32
    return %c0_i32, %c0_i32_0 : i32, i32
  }
  func.func @transform_5(%arg0: i32) -> (i32, i32) {
    %c0_i32 = arith.constant 0 : i32
    %c0_i32_0 = arith.constant 0 : i32
    %c0_i32_1 = arith.constant 0 : i32
    return %c0_i32, %c0_i32_0 : i32, i32
  }
  func.func @transform_6(%arg0: i32) -> (i32, i32) {
    %c0_i32 = arith.constant 0 : i32
    %c0_i32_0 = arith.constant 0 : i32
    %c0_i32_1 = arith.constant 0 : i32
    return %c0_i32, %c0_i32_0 : i32, i32
  }
  func.func @transform_7(%arg0: i32) -> (i32, i32) {
    %c0_i32 = arith.constant 0 : i32
    %c0_i32_0 = arith.constant 0 : i32
    %c0_i32_1 = arith.constant 0 : i32
    return %c0_i32, %c0_i32_0 : i32, i32
  }
  func.func @transform_8(%arg0: i32) -> (i32, i32) {
    %c0_i32 = arith.constant 0 : i32
    %c0_i32_0 = arith.constant 0 : i32
    %c0_i32_1 = arith.constant 0 : i32
    return %c0_i32, %c0_i32_0 : i32, i32
  }
  func.func @transform_9(%arg0: i32) -> (i32, i32) {
    %c0_i32 = arith.constant 0 : i32
    %c0_i32_0 = arith.constant 0 : i32
    %c0_i32_1 = arith.constant 0 : i32
    return %c0_i32, %c0_i32_0 : i32, i32
  }
  func.func @transform_10(%arg0: i32) -> (i32, i32) {
    %c0_i32 = arith.constant 0 : i32
    %c0_i32_0 = arith.constant 0 : i32
    %c0_i32_1 = arith.constant 0 : i32
    return %c0_i32, %c0_i32_0 : i32, i32
  }
  func.func @transform_11(%arg0: i32) -> (i32, i32) {
    %c0_i32 = arith.constant 0 : i32
    %c0_i32_0 = arith.constant 0 : i32
    %c0_i32_1 = arith.constant 0 : i32
    return %c0_i32, %c0_i32_0 : i32, i32
  }
  func.func @transform_12(%arg0: i32) -> (i32, i32) {
    %c0_i32 = arith.constant 0 : i32
    %c0_i32_0 = arith.constant 0 : i32
    %c0_i32_1 = arith.constant 0 : i32
    return %c0_i32, %c0_i32_0 : i32, i32
  }
  func.func @transform_13(%arg0: i32) -> (i32, i32) {
    %c0_i32 = arith.constant 0 : i32
    %c0_i32_0 = arith.constant 0 : i32
    %c0_i32_1 = arith.constant 0 : i32
    return %c0_i32, %c0_i32_0 : i32, i32
  }
  func.func @transform_14(%arg0: i32) -> (i32, i32) {
    %c0_i32 = arith.constant 0 : i32
    %c0_i32_0 = arith.constant 0 : i32
    %c0_i32_1 = arith.constant 0 : i32
    return %c0_i32, %c0_i32_0 : i32, i32
  }
  func.func @transform_15(%arg0: i32) -> (i32, i32) {
    %c0_i32 = arith.constant 0 : i32
    %c0_i32_0 = arith.constant 0 : i32
    %c0_i32_1 = arith.constant 0 : i32
    return %c0_i32, %c0_i32_0 : i32, i32
  }
  func.func @transform_16(%arg0: i32) -> (i32, i32) {
    %c0_i32 = arith.constant 0 : i32
    %c0_i32_0 = arith.constant 0 : i32
    %c0_i32_1 = arith.constant 0 : i32
    return %c0_i32, %c0_i32_0 : i32, i32
  }
  func.func @transform_17(%arg0: i32) -> (i32, i32) {
    %c0_i32 = arith.constant 0 : i32
    %c0_i32_0 = arith.constant 0 : i32
    %c0_i32_1 = arith.constant 0 : i32
    return %c0_i32, %c0_i32_0 : i32, i32
  }
  func.func @transform_18(%arg0: i32) -> (i32, i32, i32) {
    %c0_i32 = arith.constant 0 : i32
    %c0_i32_0 = arith.constant 0 : i32
    %c0_i32_1 = arith.constant 0 : i32
    return %arg0, %c0_i32, %c0_i32_0 : i32, i32, i32
  }
}

</mosaic_0001>

<bundles_post_ra>
// kernel: captioning_model_forward.1
= control target key start
LH: loop header
LB: loop body
LE: loop exit
PB: predicated region body
PF: predicated region fallthrough
CT: control target
= control target key end

     0   :  { %s4785_s0 = inlined_call_operand.vmem [shape: f32[2,16,48], index: 0, kind: input, shape index: {}]   ;;  %s4786_s1 = inlined_call_operand.vmem [shape: f32[2,8,32], index: 1, kind: input, shape index: {}]   ;;  %s4787_s2 = inlined_call_operand.vmem [shape: f32[24,32], index: 2, kind: input, shape index: {}]   ;;  %s4788_s3 = inlined_call_operand.vmem [shape: f32[48,32], index: 3, kind: input, shape index: {}]   ;;  %s4789_s4 = inlined_call_operand.vmem [shape: f32[1,32], index: 4, kind: input, shape index: {}]   ;;  %s4790_s5 = inlined_call_operand.vmem [shape: f32[2,32], index: 5, kind: input, shape index: {}]   ;;  %s4791_s6 = inlined_call_operand.vmem [shape: f32[32,96], index: 6, kind: input, shape index: {}]   ;;  %s4792_s7 = inlined_call_operand.vmem [shape: f32[1,96], index: 7, kind: input, shape index: {}]   ;;  %s4793_s8 = inlined_call_operand.vmem [shape: f32[32,32], index: 8, kind: input, shape index: {}]   ;;  %s4794_s9 = inlined_call_operand.vmem [shape: f32[1,32], index: 9, kind: input, shape index: {}]   ;;  %s4795_s10 = inlined_call_operand.vmem [shape: f32[2,32], index: 10, kind: input, shape index: {}]   ;;  %s4796_s11 = inlined_call_operand.vmem [shape: f32[32,64], index: 11, kind: input, shape index: {}]   ;;  %s4797_s12 = inlined_call_operand.vmem [shape: f32[1,64], index: 12, kind: input, shape index: {}]   ;;  %s4798_s13 = inlined_call_operand.vmem [shape: f32[64,32], index: 13, kind: input, shape index: {}]   ;;  %s4799_s14 = inlined_call_operand.vmem [shape: f32[1,32], index: 14, kind: input, shape index: {}]   ;;  %s4800_s15 = inlined_call_operand.vmem [shape: f32[2,32], index: 15, kind: input, shape index: {}]   ;;  %s4801_s16 = inlined_call_operand.vmem [shape: f32[32,128], index: 16, kind: input, shape index: {}]   ;;  %s4802_s17 = inlined_call_operand.vmem [shape: f32[1,128], index: 17, kind: input, shape index: {}]   ;;  %s4803_s18 = inlined_call_operand.hbm [shape: f32[2,8,128], index: 18, kind: output, shape index: {}]  }
   0x1   :  { %4807 = sst [smem:[#allocation5_spill]] %s4785_s0 }
   0x2   :  { %4808 = sst [smem:[#allocation6_spill]] %s4786_s1 }
   0x3   :  { %4809 = sst [smem:[#allocation7_spill]] %s4787_s2 }
   0x4   :  { %v69_v0 = vld [vmem:[%s4788_s3 + $0x28] sm:$0xff]  ;;  %v68_v1 = vld [vmem:[%s4788_s3 + $0x20] sm:$0xff]  ;;  %vm77_vm0 = vcmask 392192   ;;  %v67_v2 = vld [vmem:[%s4788_s3 + $0x18] sm:$0xff]  ;;  %s4810_s21 = sld [smem:[#allocation5_spill]] }
   0x5   :  { %3349 = vmatprep.subr.mxu0 %v69_v0 }
   0x6   :  { %3350 = vmatpush3.msra.mxu0 %v69_v0 }
   0x7   :  { %3351 = vmatprep.subr.mxu0 %v68_v1 }
   0xa   :  { %v60_v3 = vld [vmem:[%s4810_s21] sm:$0xff] }
   0xb   :  { %3361 = vmatprep.mubr.msk.f32.mxu0 %vm77_vm0, %v60_v3 }
   0xc   :  { %23 = vsyncpa [#allocation3], 0  ;;  %3352 = vmatpush3.msra.mxu0 %v68_v1  ;;  %v66_v4 = vld [vmem:[%s4788_s3 + $0x10] sm:$0xff]  ;;  %v65_v5 = vld [vmem:[%s4788_s3 + $0x8] sm:$0xff]  ;;  %s4811_s20 = sld [smem:[#allocation6_spill]]  ;;  %vm187_vm1 = vcmask 261120  }
   0xd   :  { %3353 = vmatprep.subr.mxu0 %v67_v2  ;;  %v64_v6 = vld [vmem:[%s4788_s3] sm:$0xff]  ;;  %v61_v7 = vld [vmem:[%s4810_s21 + $0x8] sm:$0xff]  ;;  %v62_v8 = vld [vmem:[%s4810_s21 + $0x10] sm:$0xff]  ;;  %s4812_s23 = sld [smem:[#allocation7_spill]]  ;;  %s3877_s25 = smov 96   ;;  %vm3878_vm2 = vmmov 0  }
   0xe   :  { %3354 = vmatpush3.msra.mxu0 %v67_v2  ;;  %v63_v9 = vld [vmem:[%s4810_s21 + $0x18] sm:$0xff]  ;;  %v3085_v15 = vld [vmem:[%s4789_s4] ss:$0 sm:$0xff]  ;;  %v289_v3 = vld [vmem:[%s4791_s6 + $0x10] sm:$0xff]  ;;  %vm420_vm3 = vcmask 64512   ;;  %vm620_vm4 = vcmask 195584  }
   0xf   :  { %3355 = vmatprep.subr.mxu0 %v66_v4  ;;  %v290_v2 = vld [vmem:[%s4791_s6 + $0x18] sm:$0xff]  ;;  %s3880_s21 = smov 88   ;;  %s3881_s26 = smov 120   ;;  %vm2389_vm5 = vcmask 130048   ;;  %vm2824_vm6 = vcmask 523264  }
  0x10   :  { %3356 = vmatpush3.msra.mxu0 %v66_v4  ;;  %3367 = vmatprep.subr.mxu1 %v290_v2  ;;  %v288_v4 = vld [vmem:[%s4791_s6 + $0x8] sm:$0xff]  ;;  %s3882_s27 = smov 56   ;;  %s3883_s28 = smov 80  }
  0x11   :  { %3357 = vmatprep.subr.mxu0 %v65_v5  ;;  %3368 = vmatpush3.msra.mxu1 %v290_v2  ;;  %s3884_s29 = smov 112   ;;  %s3885_s30 = smov 48  }
  0x12   :  { %3358 = vmatpush3.msra.mxu0 %v65_v5  ;;  %v175_v10 = vld [vmem:[%s4811_s20] sm:$0xff]  ;;  %v176_v24 = vld [vmem:[%s4811_s20 + $0x8] sm:$0xff]  ;;  %3369 = vmatprep.subr.mxu1 %v289_v3  ;;  %s3886_s4 = smov 72   ;;  %s3887_s0 = smov 104  }
  0x13   :  { %3359 = vmatprep.subr.mxu0 %v64_v6  ;;  %v179_v11 = vld [vmem:[%s4812_s23 + $0x10] sm:$0xff]  ;;  %v177_v17 = vld [vmem:[%s4812_s23] sm:$0xff]  ;;  %v178_v21 = vld [vmem:[%s4812_s23 + $0x8] sm:$0xff]  ;;  %3370 = vmatpush3.msra.mxu1 %v289_v3  ;;  %s3888_s19 = smov 40   ;;  %s3889_s3 = smov 8  }
  0x14   :  { %3360 = vmatpush3.msra.mxu0 %v64_v6  ;;  %v182_v12 = vadd.f32 %v179_v11, %v175_v10  ;;  %v185_v30 = vadd.f32 %v179_v11, %v176_v24  ;;  %3371 = vmatprep.subr.mxu1 %v288_v4  ;;  %v287_v5 = vld [vmem:[%s4791_s6] sm:$0xff]  ;;  %s3890_s1 = smov 16  }
  0x15   :  { %3362 = vmatmul.mubr.msk.f32.vlgmr.msra.gmra.mxu0 %vm77_vm0, %v61_v7  ;;  %3372 = vmatpush3.msra.mxu1 %v288_v4 }
  0x16   :  { %3364 = vmatprep.mubr.msk.f32.mxu0 %vm77_vm0, %v62_v8  ;;  %v194_v13 = vsel %vm187_vm1, %v182_v12, 0.0  ;;  %v203_v34 = vsel %vm187_vm1, %v185_v30, 0.0  ;;  %3373 = vmatprep.subr.mxu1 %v287_v5 }
  0x17   :  { %195 = vadd.xlane.f32.xlu1 %v194_v13  ;;  %3374 = vmatpush3.msra.mxu1 %v287_v5  ;;  %v267_v13 = vlaneseq }
  0x19   :  { %3365 = vmatmul.mubr.msk.f32.gmra.mxu0 %vm77_vm0, %v63_v9 }
  0xa0   :  { %v196_v36 = vpop.xlane.xlu1 %195 }
  0xa1   :  { %v209_v37 = vmul.f32 0.03125, %v196_v36 }
  0xa3   :  { %v4047_v39 = vsub.f32 %v182_v12, %v209_v37 }
  0xa5   :  { %v221_v47 = vmul.f32 %v4047_v39, %v4047_v39 }
  0xa7   :  { %v231_v55 = vsel %vm187_vm1, %v221_v47, 0.0 }
  0xd5   :  { %v3363_v14 = vpop.f32.mrf.mxu0 }
  0xd6   :  { %v162_v18 = vadd.f32 %v3363_v14, %v3085_v15 }
  0xd7   :  { %v156_v16 = vpop.f32.mrf.mxu0 }
  0xd8   :  { %v157_v19 = vadd.f32 %v3085_v15, %v156_v16  ;;  %v181_v28 = vadd.f32 %v178_v21, %v162_v18 }
  0xd9   :  { %v3366_v20 = vpop.f32.mrf.mxu0 }
  0xda   :  { %v180_v22 = vadd.f32 %v177_v17, %v157_v19  ;;  %v172_v25 = vadd.f32 %v3366_v20, %v3085_v15  ;;  %v191_v32 = vsel %vm187_vm1, %v181_v28, 0.0  ;;  %v268_v20 = vshrl.u32 %v267_v13, 7 }
  0xdb   :  { %v166_v23 = vpop.f32.mrf.mxu0 }
  0xdc   :  { %v167_v26 = vadd.f32 %v3085_v15, %v166_v23  ;;  %v188_v27 = vsel %vm187_vm1, %v180_v22, 0.0  ;;  %v184_v33 = vadd.f32 %v178_v21, %v172_v25  ;;  %v4089_v25 = vsub.s32 0, %v268_v20 }
  0xdd   :  { %189 = vadd.xlane.f32.xlu0 %v188_v27 }
  0xde   :  { %v183_v29 = vadd.f32 %v177_v17, %v167_v26  ;;  %v200_v35 = vsel %vm187_vm1, %v184_v33, 0.0  ;;  %v186_v26 = vld [vmem:[%s4790_s5] sm:$0x3] }
  0xe0   :  { %v197_v31 = vsel %vm187_vm1, %v183_v29, 0.0 }
  0xe1   :  { %198 = vadd.xlane.f32.xlu1 %v197_v31  ;;  %192 = vadd.xlane.f32.xlu0 %v191_v32 }
  0xe5   :  { %201 = vadd.xlane.f32.xlu0 %v200_v35  ;;  %204 = vadd.xlane.f32.xlu1 %v203_v34 }
 0x166   :  { %v190_v38 = vpop.xlane.xlu0 %189 }
 0x167   :  { %v207_v40 = vmul.f32 0.03125, %v190_v38 }
 0x169   :  { %v4049_v41 = vsub.f32 %v180_v22, %v207_v40 }
 0x16a   :  { %v199_v42 = vpop.xlane.xlu1 %198  ;;  %v193_v43 = vpop.xlane.xlu0 %192 }
 0x16b   :  { %v210_v44 = vmul.f32 0.03125, %v199_v42  ;;  %v208_v45 = vmul.f32 0.03125, %v193_v43  ;;  %v219_v46 = vmul.f32 %v4049_v41, %v4049_v41 }
 0x16d   :  { %v4055_v48 = vsub.f32 %v183_v29, %v210_v44  ;;  %v4057_v49 = vsub.f32 %v181_v28, %v208_v45  ;;  %v225_v50 = vsel %vm187_vm1, %v219_v46, 0.0  ;;  %v4094_v28 = vsub.s32 1, %v268_v20 }
 0x16e   :  { %226 = vadd.xlane.f32.xlu0 %v225_v50  ;;  %v202_v51 = vpop.xlane.xlu0 %201  ;;  %v205_v52 = vpop.xlane.xlu1 %204  ;;  %v270_v29 = vrot.slane %v186_v26, %v4089_v25 }
 0x16f   :  { %v211_v53 = vmul.f32 0.03125, %v202_v51  ;;  %v212_v54 = vmul.f32 0.03125, %v205_v52  ;;  %v220_v56 = vmul.f32 %v4057_v49, %v4057_v49  ;;  %v222_v60 = vmul.f32 %v4055_v48, %v4055_v48 }
 0x170   :  { %v280_v32 = vrot.slane %v186_v26, %v4094_v28 }
 0x171   :  { %v4063_v57 = vsub.f32 %v184_v33, %v211_v53  ;;  %v4065_v58 = vsub.f32 %v185_v30, %v212_v54  ;;  %v228_v59 = vsel %vm187_vm1, %v220_v56, 0.0  ;;  %v234_v63 = vsel %vm187_vm1, %v222_v60, 0.0  ;;  %v3090_v56 = vld [vmem:[%s4792_s7] ss:$0 sm:$0xff]  ;;  %s3879_s7 = smov 64  }
 0x172   :  { %232 = vadd.xlane.f32.xlu0 %v231_v55  ;;  %229 = vadd.xlane.f32.xlu1 %v228_v59  ;;  %v3876_v55 = vmov 0.0  }
 0x173   :  { %v223_v61 = vmul.f32 %v4063_v57, %v4063_v57  ;;  %v224_v62 = vmul.f32 %v4065_v58, %v4065_v58  ;;  %3384 = vmatprep.subr.mxu1 %v3876_v55  ;;  %3399 = vmatprep.subr.mxu0 %v3876_v55 }
 0x174   :  { %3405 = vmatprep.mubr.msk.f32.mxu0 %vm3878_vm2, %v3876_v55 }
 0x175   :  { %v237_v0 = vsel %vm187_vm1, %v223_v61, 0.0  ;;  %v240_v1 = vsel %vm187_vm1, %v224_v62, 0.0 }
 0x176   :  { %235 = vadd.xlane.f32.xlu1 %v234_v63  ;;  %238 = vadd.xlane.f32.xlu0 %v237_v0 }
 0x17a   :  { %241 = vadd.xlane.f32.xlu1 %v240_v1 }
 0x1f7   :  { %v227_v6 = vpop.xlane.xlu0 %226 }
 0x1f8   :  { %v243_v7 = vmul.f32 0.03125, %v227_v6 }
 0x1fa   :  { %v249_v8 = vadd.f32 1e-12, %v243_v7 }
 0x1fb   :  { %v230_v9 = vpop.xlane.xlu1 %229  ;;  %v233_v10 = vpop.xlane.xlu0 %232 }
 0x1fc   :  { %3718 = vrsqrt.f32 %v249_v8  ;;  %v244_v11 = vmul.f32 0.03125, %v230_v9  ;;  %v245_v12 = vmul.f32 0.03125, %v233_v10 }
 0x1fe   :  { %v250_v14 = vadd.f32 1e-12, %v244_v11  ;;  %v251_v15 = vadd.f32 1e-12, %v245_v12 }
 0x1ff   :  { %v236_v16 = vpop.xlane.xlu1 %235  ;;  %v239_v17 = vpop.xlane.xlu0 %238 }
 0x200   :  { %3720 = vrsqrt.f32 %v250_v14  ;;  %v246_v18 = vmul.f32 0.03125, %v236_v16  ;;  %v247_v19 = vmul.f32 0.03125, %v239_v17 }
 0x201   :  { %3722 = vrsqrt.f32 %v251_v15 }
 0x202   :  { %v252_v21 = vadd.f32 1e-12, %v246_v18  ;;  %v253_v22 = vadd.f32 1e-12, %v247_v19 }
 0x203   :  { %v242_v23 = vpop.xlane.xlu1 %241 }
 0x204   :  { %3724 = vrsqrt.f32 %v252_v21  ;;  %v248_v24 = vmul.f32 0.03125, %v242_v23 }
 0x205   :  { %3726 = vrsqrt.f32 %v253_v22 }
 0x206   :  { %v254_v27 = vadd.f32 1e-12, %v248_v24 }
 0x208   :  { %3728 = vrsqrt.f32 %v254_v27 }
 0x209   :  { %v3719_v30 = vpop.eup %3718 }
 0x20a   :  { %v261_v31 = vmul.f32 %v3719_v30, %v4049_v41 }
 0x20c   :  { %v271_v33 = vmul.f32 %v270_v29, %v261_v31 }
 0x20d   :  { %v3721_v34 = vpop.eup %3720 }
 0x20e   :  { %v3723_v35 = vpop.eup %3722  ;;  %v4099_v36 = vadd.f32 %v280_v32, %v271_v33  ;;  %v262_v37 = vmul.f32 %v3721_v34, %v4057_v49 }
 0x20f   :  { %v263_v38 = vmul.f32 %v3723_v35, %v4047_v39 }
 0x210   :  { %3375 = vmatprep.mubr.msk.f32.mxu1 %vm187_vm1, %v4099_v36  ;;  %v272_v40 = vmul.f32 %v270_v29, %v262_v37 }
 0x211   :  { %v3725_v42 = vpop.eup %3724  ;;  %v273_v43 = vmul.f32 %v270_v29, %v263_v38 }
 0x212   :  { %v3727_v44 = vpop.eup %3726  ;;  %v4105_v45 = vadd.f32 %v280_v32, %v272_v40  ;;  %v264_v41 = vmul.f32 %v3725_v42, %v4055_v48 }
 0x213   :  { %v4108_v46 = vadd.f32 %v280_v32, %v273_v43  ;;  %v265_v47 = vmul.f32 %v3727_v44, %v4063_v57 }
 0x214   :  { %3376 = vmatmul.mubr.msk.f32.vlgmr.msra.gmra.mxu1 %vm187_vm1, %v4105_v45  ;;  %v274_v49 = vmul.f32 %v270_v29, %v264_v41 }
 0x215   :  { %v3729_v39 = vpop.eup %3728  ;;  %3378 = vmatprep.mubr.msk.f32.mxu1 %vm187_vm1, %v4108_v46  ;;  %v275_v50 = vmul.f32 %v270_v29, %v265_v47 }
 0x216   :  { %v4115_v51 = vadd.f32 %v280_v32, %v274_v49  ;;  %v266_v52 = vmul.f32 %v3729_v39, %v4065_v58 }
 0x217   :  { %v4118_v53 = vadd.f32 %v280_v32, %v275_v50 }
 0x218   :  { %3379 = vmatmul.mubr.msk.f32.gmra.mxu1 %vm187_vm1, %v4115_v51  ;;  %v276_v48 = vmul.f32 %v270_v29, %v266_v52 }
 0x219   :  { %3381 = vmatprep.mubr.msk.f32.mxu1 %vm187_vm1, %v4118_v53 }
 0x21a   :  { %v4124_v54 = vadd.f32 %v280_v32, %v276_v48 }
 0x21c   :  { %3382 = vmatmul.mubr.msk.f32.gmra.mxu1 %vm187_vm1, %v4124_v54 }
 0x21d   :  { %3390 = vmatprep.mubr.msk.f32.mxu1 %vm3878_vm2, %v3876_v55 }
 0x2d4   :  { %v3377_v57 = vpop.f32.mrf.mxu1 }
 0x2d5   :  { %v4133_v58 = vadd.f32 %v3377_v57, %v3090_v56 }
 0x2d6   :  { %v382_v59 = vpop.f32.mrf.mxu1 }
 0x2d7   :  { %416 = vrot.lane.b32.xlu1 %v4133_v58, %s3877_s25  ;;  %v4148_v3 = vadd.f32 %v3090_v56, %v382_v59 }
 0x2d8   :  { %v3380_v60 = vpop.f32.mrf.mxu1 }
 0x2d9   :  { %v4152_v4 = vadd.f32 %v3380_v60, %v3090_v56 }
 0x2da   :  { %v392_v61 = vpop.f32.mrf.mxu1 }
 0x2db   :  { %v4140_v62 = vadd.f32 %v3090_v56, %v392_v61 }
 0x2dc   :  { %v3383_v63 = vpop.f32.mrf.mxu1 }
 0x2dd   :  { %v4142_v0 = vadd.f32 %v3383_v63, %v3090_v56  ;;  %418 = vrot.lane.b32.xlu0 %v4140_v62, %s3877_s25 }
 0x2de   :  { %v402_v1 = vpop.f32.mrf.mxu1 }
 0x2df   :  { %v4145_v2 = vadd.f32 %v3090_v56, %v402_v1  ;;  %520 = vrot.lane.b32.xlu1 %v4142_v0, %s3877_s25 }
 0x2e1   :  { %518 = vrot.lane.b32.xlu0 %v4145_v2, %s3877_s25 }
 0x2e3   :  { %414 = vrot.lane.b32.xlu1 %v4148_v3, %s3877_s25 }
 0x2e7   :  { %516 = vrot.lane.b32.xlu1 %v4152_v4, %s3877_s25 }
 0x349   :  { %v417_v5 = vpop.permute.xlu1 %416 }
 0x34f   :  { %v419_v6 = vpop.permute.xlu0 %418 }
 0x350   :  { %3385 = vmatpush3.xpose.msk.msra.mxu1 %vm420_vm3, %v419_v6 }
 0x351   :  { %v521_v7 = vpop.permute.xlu1 %520  ;;  %3386 = vmatprep.subr.mxu1 %v3876_v55 }
 0x352   :  { %3400 = vmatpush3.xpose.msk.msra.mxu0 %vm420_vm3, %v521_v7 }
 0x353   :  { %3401 = vmatprep.subr.mxu0 %v3876_v55  ;;  %v519_v8 = vpop.permute.xlu0 %518 }
 0x354   :  { %3387 = vmatpush3.xpose.msk.msra.mxu1 %vm420_vm3, %v417_v5 }
 0x355   :  { %v415_v9 = vpop.permute.xlu1 %414  ;;  %3388 = vmatprep.subr.mxu1 %v3876_v55 }
 0x356   :  { %3402 = vmatpush3.xpose.msk.msra.mxu0 %vm420_vm3, %v519_v8 }
 0x357   :  { %3403 = vmatprep.subr.mxu0 %v3876_v55 }
 0x358   :  { %3389 = vmatpush3.xpose.msk.msra.mxu1 %vm420_vm3, %v415_v9 }
 0x359   :  { %v517_v10 = vpop.permute.xlu1 %516  ;;  %3414 = vmatprep.subr.mxu1 %v3876_v55 }
 0x35a   :  { %3404 = vmatpush3.xpose.msk.msra.mxu0 %vm420_vm3, %v517_v10 }
 0x35b   :  { %3391 = vmatmul.mubr.msk.f32.vlgmr.msra.gmra.mxu1 %vm420_vm3, %v4148_v3  ;;  %3429 = vmatprep.subr.mxu0 %v3876_v55 }
 0x35c   :  { %3393 = vmatprep.mubr.msk.f32.mxu1 %vm3878_vm2, %v3876_v55 }
 0x35d   :  { %3406 = vmatmul.mubr.msk.f32.vlgmr.msra.gmra.mxu0 %vm420_vm3, %v4152_v4 }
 0x35e   :  { %3408 = vmatprep.mubr.msk.f32.mxu0 %vm3878_vm2, %v3876_v55 }
 0x35f   :  { %3394 = vmatmul.mubr.msk.f32.gmra.mxu1 %vm420_vm3, %v4133_v58 }
 0x360   :  { %3396 = vmatprep.mubr.msk.f32.mxu1 %vm3878_vm2, %v3876_v55 }
 0x361   :  { %3409 = vmatmul.mubr.msk.f32.gmra.mxu0 %vm420_vm3, %v4145_v2 }
 0x362   :  { %3411 = vmatprep.mubr.msk.f32.mxu0 %vm3878_vm2, %v3876_v55 }
 0x363   :  { %3397 = vmatmul.mubr.msk.f32.gmra.mxu1 %vm420_vm3, %v4140_v62 }
 0x364   :  { %3420 = vmatprep.mubr.msk.f32.mxu1 %vm3878_vm2, %v3876_v55 }
 0x365   :  { %3412 = vmatmul.mubr.msk.f32.gmra.mxu0 %vm420_vm3, %v4142_v0 }
 0x366   :  { %3435 = vmatprep.mubr.msk.f32.mxu0 %vm3878_vm2, %v3876_v55 }
 0x41b   :  { %v499_v11 = vpop.f32.mrf.mxu1 }
 0x41c   :  { %v614_v12 = vmul.f32 0.35355338, %v499_v11 }
 0x41d   :  { %v3392_v13 = vpop.f32.mrf.mxu1  ;;  %v600_v14 = vpop.f32.mrf.mxu0 }
 0x41e   :  { %v617_v15 = vmul.f32 0.35355338, %v600_v14  ;;  %v621_v16 = vsel %vm620_vm4, %v614_v12, -inf }
 0x41f   :  { %622 = vmax.xlane.f32.xlu0 %v621_v16  ;;  %v504_v17 = vpop.f32.mrf.mxu1  ;;  %v3407_v18 = vpop.f32.mrf.mxu0 }
 0x420   :  { %v615_v19 = vmul.f32 0.35355338, %v504_v17  ;;  %v630_v23 = vsel %vm620_vm4, %v617_v15, -inf }
 0x421   :  { %v3395_v20 = vpop.f32.mrf.mxu1  ;;  %v605_v21 = vpop.f32.mrf.mxu0 }
 0x422   :  { %v624_v22 = vsel %vm620_vm4, %v615_v19, -inf  ;;  %v618_v31 = vmul.f32 0.35355338, %v605_v21 }
 0x423   :  { %625 = vmax.xlane.f32.xlu1 %v624_v22  ;;  %v509_v24 = vpop.f32.mrf.mxu1  ;;  %631 = vmax.xlane.f32.xlu0 %v630_v23  ;;  %v3410_v26 = vpop.f32.mrf.mxu0 }
 0x424   :  { %v4194_v27 = vmul.f32 0.35355338, %v509_v24  ;;  %v633_v34 = vsel %vm620_vm4, %v618_v31, -inf }
 0x425   :  { %v3398_v29 = vpop.f32.mrf.mxu1  ;;  %v610_v30 = vpop.f32.mrf.mxu0 }
 0x426   :  { %v627_v32 = vsel %vm620_vm4, %v4194_v27, -inf  ;;  %v4211_v35 = vmul.f32 0.35355338, %v610_v30 }
 0x427   :  { %628 = vmax.xlane.f32.xlu0 %v627_v32  ;;  %v3413_v33 = vpop.f32.mrf.mxu0 }
 0x428   :  { %v636_v37 = vsel %vm620_vm4, %v4211_v35, -inf }
 0x42b   :  { %634 = vmax.xlane.f32.xlu0 %v633_v34 }
 0x434   :  { %689 = vrot.lane.b32.xlu1 %v4133_v58, %s3879_s7 }
 0x438   :  { %687 = vrot.lane.b32.xlu1 %v4148_v3, %s3879_s7 }
 0x43c   :  { %789 = vrot.lane.b32.xlu1 %v4142_v0, %s3879_s7 }
 0x440   :  { %787 = vrot.lane.b32.xlu1 %v4145_v2, %s3879_s7 }
 0x441   :  { %691 = vrot.lane.b32.xlu0 %v4140_v62, %s3879_s7 }
 0x444   :  { %891 = vrot.lane.b32.xlu1 %v4133_v58, %s3880_s21 }
 0x445   :  { %893 = vrot.lane.b32.xlu0 %v4140_v62, %s3880_s21 }
 0x449   :  { %785 = vrot.lane.b32.xlu0 %v4152_v4, %s3879_s7  ;;  %s3891_s7 = smov 24  }
 0x44d   :  { %997 = vrot.lane.b32.xlu0 %v4142_v0, %s3880_s21 }
 0x468   :  { %637 = vmax.xlane.f32.xlu1 %v636_v37 }
 0x479   :  { %889 = vrot.lane.b32.xlu1 %v4148_v3, %s3880_s21 }
 0x4a8   :  { %v623_v38 = vpop.xlane.xlu0 %622 }
 0x4a9   :  { %v639_v40 = vsub.f32 %v614_v12, %v623_v38 }
 0x4ab   :  { %v645_v42 = vmul.f32 1.442695, %v639_v40 }
 0x4ac   :  { %v626_v43 = vpop.xlane.xlu1 %625  ;;  %v632_v44 = vpop.xlane.xlu0 %631 }
 0x4ad   :  { %3730 = vpow2.f32 %v645_v42  ;;  %v640_v41 = vsub.f32 %v615_v19, %v626_v43  ;;  %v642_v47 = vsub.f32 %v617_v15, %v632_v44 }
 0x4af   :  { %v647_v49 = vmul.f32 1.442695, %v640_v41  ;;  %v651_v39 = vmul.f32 1.442695, %v642_v47 }
 0x4b0   :  { %v690_v50 = vpop.permute.xlu1 %689  ;;  %v629_v52 = vpop.xlane.xlu0 %628 }
 0x4b1   :  { %3732 = vpow2.f32 %v647_v49  ;;  %v641_v14 = vsub.f32 %v4194_v27, %v629_v52 }
 0x4b2   :  { %3734 = vpow2.f32 %v651_v39 }
 0x4b3   :  { %v649_v15 = vmul.f32 1.442695, %v641_v14 }
 0x4b4   :  { %v688_v48 = vpop.permute.xlu1 %687  ;;  %v635_v56 = vpop.xlane.xlu0 %634 }
 0x4b5   :  { %v643_v57 = vsub.f32 %v618_v31, %v635_v56 }
 0x4b7   :  { %v653_v59 = vmul.f32 1.442695, %v643_v57 }
 0x4b8   :  { %v790_v60 = vpop.permute.xlu1 %789  ;;  %v692_v61 = vpop.permute.xlu0 %691 }
 0x4b9   :  { %3736 = vpow2.f32 %v653_v59  ;;  %3415 = vmatpush3.msra.mxu1 %v692_v61  ;;  %3430 = vmatpush3.msra.mxu0 %v790_v60 }
 0x4ba   :  { %v3731_v63 = vpop.eup %3730  ;;  %3416 = vmatprep.subr.mxu1 %v3876_v55  ;;  %3431 = vmatprep.subr.mxu0 %v3876_v55  ;;  %3738 = vpow2.f32 %v649_v15 }
 0x4bb   :  { %3417 = vmatpush3.msra.mxu1 %v690_v50  ;;  %v657_v1 = vsel %vm620_vm4, %v3731_v63, 0.0 }
 0x4bc   :  { %v788_v5 = vpop.permute.xlu1 %787  ;;  %658 = vadd.xlane.f32.xlu0 %v657_v1  ;;  %3418 = vmatprep.subr.mxu1 %v3876_v55  ;;  %v894_v6 = vpop.permute.xlu0 %893 }
 0x4bd   :  { %3419 = vmatpush3.msra.mxu1 %v688_v48  ;;  %3432 = vmatpush3.msra.mxu0 %v788_v5 }
 0x4be   :  { %v3733_v7 = vpop.eup %3732  ;;  %3433 = vmatprep.subr.mxu0 %v3876_v55  ;;  %3444 = vmatprep.subr.mxu1 %v3876_v55 }
 0x4bf   :  { %v3735_v8 = vpop.eup %3734  ;;  %v660_v9 = vsel %vm620_vm4, %v3733_v7, 0.0 }
 0x4c0   :  { %661 = vadd.xlane.f32.xlu1 %v660_v9  ;;  %v666_v10 = vsel %vm620_vm4, %v3735_v8, 0.0  ;;  %v786_v11 = vpop.permute.xlu0 %785  ;;  %v892_v16 = vpop.permute.xlu1 %891 }
 0x4c1   :  { %667 = vadd.xlane.f32.xlu0 %v666_v10  ;;  %3434 = vmatpush3.msra.mxu0 %v786_v11 }
 0x4c2   :  { %3459 = vmatprep.subr.mxu0 %v3876_v55 }
 0x4c4   :  { %v998_v24 = vpop.permute.xlu0 %997 }
 0x4c6   :  { %v3737_v12 = vpop.eup %3736 }
 0x4c7   :  { %v669_v13 = vsel %vm620_vm4, %v3737_v12, 0.0  ;;  %v3739_v20 = vpop.eup %3738 }
 0x4c8   :  { %670 = vadd.xlane.f32.xlu0 %v669_v13  ;;  %v663_v21 = vsel %vm620_vm4, %v3739_v20, 0.0 }
 0x4d1   :  { %883 = vrot.lane.b32.xlu1 %v4148_v3, %s3881_s26 }
 0x4d5   :  { %885 = vrot.lane.b32.xlu1 %v4133_v58, %s3881_s26 }
 0x4de   :  { %995 = vrot.lane.b32.xlu0 %v4145_v2, %s3880_s21 }
 0x4e2   :  { %993 = vrot.lane.b32.xlu0 %v4152_v4, %s3880_s21 }
 0x4e6   :  { %987 = vrot.lane.b32.xlu0 %v4152_v4, %s3881_s26 }
 0x4ea   :  { %989 = vrot.lane.b32.xlu0 %v4145_v2, %s3881_s26 }
 0x4f1   :  { %v638_v17 = vpop.xlane.xlu1 %637 }
 0x4f2   :  { %v644_v18 = vsub.f32 %v4211_v35, %v638_v17 }
 0x4f4   :  { %v655_v19 = vmul.f32 1.442695, %v644_v18 }
 0x4f5   :  { %v890_v26 = vpop.permute.xlu1 %889 }
 0x4f6   :  { %3740 = vpow2.f32 %v655_v19 }
 0x4f9   :  { %664 = vadd.xlane.f32.xlu1 %v663_v21 }
 0x503   :  { %v3741_v22 = vpop.eup %3740 }
 0x504   :  { %v672_v23 = vsel %vm620_vm4, %v3741_v22, 0.0 }
 0x505   :  { %673 = vadd.xlane.f32.xlu1 %v672_v23 }
 0x516   :  { %887 = vrot.lane.b32.xlu1 %v4140_v62, %s3881_s26 }
 0x51a   :  { %991 = vrot.lane.b32.xlu1 %v4142_v0, %s3881_s26 }
 0x545   :  { %v659_v27 = vpop.xlane.xlu0 %658 }
 0x546   :  { %3742 = vrcp.f32 %v659_v27 }
 0x549   :  { %v662_v29 = vpop.xlane.xlu1 %661 }
 0x54a   :  { %3744 = vrcp.f32 %v662_v29  ;;  %v668_v30 = vpop.xlane.xlu0 %667 }
 0x54b   :  { %3746 = vrcp.f32 %v668_v30 }
 0x54d   :  { %v884_v41 = vpop.permute.xlu1 %883 }
 0x551   :  { %v671_v31 = vpop.xlane.xlu0 %670  ;;  %v886_v47 = vpop.permute.xlu1 %885 }
 0x552   :  { %3748 = vrcp.f32 %v671_v31 }
 0x553   :  { %v3743_v32 = vpop.eup %3742 }
 0x554   :  { %v681_v33 = vmul.f32 %v3743_v32, %v3731_v63 }
 0x555   :  { %v996_v40 = vpop.permute.xlu0 %995 }
 0x556   :  { %3421 = vmatmul.mubr.msk.f32.vlgmr.msra.gmra.mxu1 %vm620_vm4, %v681_v33 }
 0x557   :  { %v3745_v34 = vpop.eup %3744  ;;  %3445 = vmatpush3.xpose.msk.msra.mxu1 %vm420_vm3, %v894_v6  ;;  %3423 = vmatprep.mubr.msk.f32.mxu1 %vm3878_vm2, %v3876_v55 }
 0x558   :  { %v3747_v35 = vpop.eup %3746  ;;  %3446 = vmatprep.subr.mxu1 %v3876_v55  ;;  %v682_v37 = vmul.f32 %v3745_v34, %v3733_v7 }
 0x559   :  { %v684_v38 = vmul.f32 %v3747_v35, %v3735_v8  ;;  %v994_v44 = vpop.permute.xlu0 %993 }
 0x55a   :  { %3424 = vmatmul.mubr.msk.f32.gmra.mxu1 %vm620_vm4, %v682_v37 }
 0x55b   :  { %3436 = vmatmul.mubr.msk.f32.vlgmr.msra.gmra.mxu0 %vm620_vm4, %v684_v38  ;;  %3447 = vmatpush3.xpose.msk.msra.mxu1 %vm420_vm3, %v892_v16 }
 0x55c   :  { %3460 = vmatpush3.xpose.msk.msra.mxu0 %vm420_vm3, %v998_v24  ;;  %3448 = vmatprep.subr.mxu1 %v3876_v55 }
 0x55d   :  { %3461 = vmatprep.subr.mxu0 %v3876_v55  ;;  %3438 = vmatprep.mubr.msk.f32.mxu0 %vm3878_vm2, %v3876_v55  ;;  %v988_v59 = vpop.permute.xlu0 %987 }
 0x55e   :  { %3426 = vmatprep.mubr.msk.f32.mxu1 %vm3878_vm2, %v3876_v55 }
 0x55f   :  { %v3749_v42 = vpop.eup %3748  ;;  %3449 = vmatpush3.xpose.msk.msra.mxu1 %vm420_vm3, %v890_v26 }
 0x560   :  { %3462 = vmatpush3.xpose.msk.msra.mxu0 %vm420_vm3, %v996_v40  ;;  %v685_v43 = vmul.f32 %v3749_v42, %v3737_v12  ;;  %3474 = vmatprep.subr.mxu1 %v3876_v55 }
 0x561   :  { %3463 = vmatprep.subr.mxu0 %v3876_v55  ;;  %v990_v60 = vpop.permute.xlu0 %989 }
 0x562   :  { %3439 = vmatmul.mubr.msk.f32.gmra.mxu0 %vm620_vm4, %v685_v43 }
 0x563   :  { %3441 = vmatprep.mubr.msk.f32.mxu0 %vm3878_vm2, %v3876_v55 }
 0x564   :  { %3464 = vmatpush3.xpose.msk.msra.mxu0 %vm420_vm3, %v994_v44 }
 0x565   :  { %3489 = vmatprep.subr.mxu0 %v3876_v55 }
 0x582   :  { %v665_v49 = vpop.xlane.xlu1 %664 }
 0x583   :  { %3750 = vrcp.f32 %v665_v49 }
 0x58e   :  { %v674_v39 = vpop.xlane.xlu1 %673 }
 0x58f   :  { %3752 = vrcp.f32 %v674_v39 }
 0x590   :  { %v3751_v50 = vpop.eup %3750 }
 0x591   :  { %v683_v52 = vmul.f32 %v3751_v50, %v3739_v20 }
 0x592   :  { %v888_v57 = vpop.permute.xlu1 %887 }
 0x593   :  { %3427 = vmatmul.mubr.msk.f32.gmra.mxu1 %vm620_vm4, %v683_v52 }
 0x594   :  { %3450 = vmatprep.mubr.msk.f32.mxu1 %vm3878_vm2, %v3876_v55 }
 0x596   :  { %v992_v61 = vpop.permute.xlu1 %991 }
 0x597   :  { %3451 = vmatmul.mubr.msk.f32.vlgmr.msra.gmra.mxu1 %vm420_vm3, %v884_v41 }
 0x598   :  { %3453 = vmatprep.mubr.msk.f32.mxu1 %vm3878_vm2, %v3876_v55 }
 0x59b   :  { %3454 = vmatmul.mubr.msk.f32.gmra.mxu1 %vm420_vm3, %v886_v47 }
 0x59c   :  { %v3753_v48 = vpop.eup %3752  ;;  %3456 = vmatprep.mubr.msk.f32.mxu1 %vm3878_vm2, %v3876_v55 }
 0x59d   :  { %v686_v56 = vmul.f32 %v3753_v48, %v3741_v22 }
 0x59f   :  { %3442 = vmatmul.mubr.msk.f32.gmra.mxu0 %vm620_vm4, %v686_v56  ;;  %3457 = vmatmul.mubr.msk.f32.gmra.mxu1 %vm420_vm3, %v888_v57 }
 0x5a0   :  { %3465 = vmatprep.mubr.msk.f32.mxu0 %vm3878_vm2, %v3876_v55  ;;  %3480 = vmatprep.mubr.msk.f32.mxu1 %vm3878_vm2, %v3876_v55 }
 0x5a3   :  { %3466 = vmatmul.mubr.msk.f32.vlgmr.msra.gmra.mxu0 %vm420_vm3, %v988_v59 }
 0x5a4   :  { %3468 = vmatprep.mubr.msk.f32.mxu0 %vm3878_vm2, %v3876_v55 }
 0x5a7   :  { %3469 = vmatmul.mubr.msk.f32.gmra.mxu0 %vm420_vm3, %v990_v60 }
 0x5a8   :  { %3471 = vmatprep.mubr.msk.f32.mxu0 %vm3878_vm2, %v3876_v55 }
 0x5ab   :  { %3472 = vmatmul.mubr.msk.f32.gmra.mxu0 %vm420_vm3, %v992_v61 }
 0x5ac   :  { %3495 = vmatprep.mubr.msk.f32.mxu0 %vm3878_vm2, %v3876_v55 }
 0x616   :  { %v4289_v63 = vpop.f32.mrf.mxu1 }
 0x618   :  { %v3422_v1 = vpop.f32.mrf.mxu1 }
 0x61a   :  { %v4291_v5 = vpop.f32.mrf.mxu1 }
 0x61b   :  { %v4293_v6 = vpop.f32.mrf.mxu0 }
 0x61c   :  { %v3425_v7 = vpop.f32.mrf.mxu1 }
 0x61d   :  { %v3437_v8 = vpop.f32.mrf.mxu0 }
 0x622   :  { %v4295_v9 = vpop.f32.mrf.mxu0 }
 0x624   :  { %v3440_v10 = vpop.f32.mrf.mxu0 }
 0x653   :  { %v4297_v11 = vpop.f32.mrf.mxu1 }
 0x655   :  { %v3428_v12 = vpop.f32.mrf.mxu1 }
 0x657   :  { %v973_v13 = vpop.f32.mrf.mxu1 }
 0x658   :  { %v1091_v14 = vmul.f32 0.35355338, %v973_v13 }
 0x659   :  { %v3452_v15 = vpop.f32.mrf.mxu1 }
 0x65a   :  { %v1097_v16 = vsel %vm620_vm4, %v1091_v14, -inf }
 0x65b   :  { %1098 = vmax.xlane.f32.xlu0 %v1097_v16  ;;  %v978_v17 = vpop.f32.mrf.mxu1 }
 0x65c   :  { %v1092_v18 = vmul.f32 0.35355338, %v978_v17 }
 0x65d   :  { %v3455_v19 = vpop.f32.mrf.mxu1 }
 0x65e   :  { %v1100_v20 = vsel %vm620_vm4, %v1092_v18, -inf }
 0x65f   :  { %1101 = vmax.xlane.f32.xlu1 %v1100_v20  ;;  %v4301_v21 = vpop.f32.mrf.mxu0  ;;  %v983_v22 = vpop.f32.mrf.mxu1 }
 0x660   :  { %v4303_v30 = vmul.f32 0.35355338, %v983_v22 }
 0x661   :  { %v3443_v23 = vpop.f32.mrf.mxu0  ;;  %v3458_v24 = vpop.f32.mrf.mxu1 }
 0x662   :  { %v1103_v35 = vsel %vm620_vm4, %v4303_v30, -inf }
 0x663   :  { %v1077_v26 = vpop.f32.mrf.mxu0 }
 0x664   :  { %v1094_v27 = vmul.f32 0.35355338, %v1077_v26 }
 0x665   :  { %v3467_v29 = vpop.f32.mrf.mxu0 }
 0x666   :  { %v1106_v31 = vsel %vm620_vm4, %v1094_v27, -inf }
 0x667   :  { %1107 = vmax.xlane.f32.xlu0 %v1106_v31  ;;  %v1082_v32 = vpop.f32.mrf.mxu0 }
 0x668   :  { %v1095_v34 = vmul.f32 0.35355338, %v1082_v32 }
 0x669   :  { %v3470_v33 = vpop.f32.mrf.mxu0 }
 0x66a   :  { %v1109_v40 = vsel %vm620_vm4, %v1095_v34, -inf }
 0x66b   :  { %1104 = vmax.xlane.f32.xlu0 %v1103_v35  ;;  %v1087_v37 = vpop.f32.mrf.mxu0 }
 0x66c   :  { %v4321_v42 = vmul.f32 0.35355338, %v1087_v37 }
 0x66d   :  { %v3473_v38 = vpop.f32.mrf.mxu0 }
 0x66e   :  { %v1112_v43 = vsel %vm620_vm4, %v4321_v42, -inf }
 0x66f   :  { %1110 = vmax.xlane.f32.xlu0 %v1109_v40 }
 0x670   :  { %1165 = vrot.lane.b32.xlu1 %v4133_v58, %s3882_s27 }
 0x674   :  { %1163 = vrot.lane.b32.xlu1 %v4148_v3, %s3882_s27 }
 0x678   :  { %1265 = vrot.lane.b32.xlu1 %v4142_v0, %s3882_s27 }
 0x67c   :  { %1263 = vrot.lane.b32.xlu1 %v4145_v2, %s3882_s27 }
 0x680   :  { %1367 = vrot.lane.b32.xlu1 %v4133_v58, %s3883_s28 }
 0x685   :  { %1167 = vrot.lane.b32.xlu0 %v4140_v62, %s3882_s27 }
 0x689   :  { %1369 = vrot.lane.b32.xlu0 %v4140_v62, %s3883_s28 }
 0x68d   :  { %1261 = vrot.lane.b32.xlu0 %v4152_v4, %s3882_s27 }
 0x691   :  { %1473 = vrot.lane.b32.xlu0 %v4142_v0, %s3883_s28 }
 0x6a4   :  { %1113 = vmax.xlane.f32.xlu1 %v1112_v43 }
 0x6b5   :  { %1365 = vrot.lane.b32.xlu1 %v4148_v3, %s3883_s28 }
 0x6e4   :  { %v1099_v44 = vpop.xlane.xlu0 %1098 }
 0x6e5   :  { %v1115_v41 = vsub.f32 %v1091_v14, %v1099_v44 }
 0x6e7   :  { %v1121_v47 = vmul.f32 1.442695, %v1115_v41 }
 0x6e8   :  { %v1102_v49 = vpop.xlane.xlu1 %1101 }
 0x6e9   :  { %3754 = vpow2.f32 %v1121_v47  ;;  %v1116_v39 = vsub.f32 %v1092_v18, %v1102_v49 }
 0x6eb   :  { %v1123_v50 = vmul.f32 1.442695, %v1116_v39 }
 0x6ec   :  { %v1166_v52 = vpop.permute.xlu1 %1165 }
 0x6ed   :  { %3756 = vpow2.f32 %v1123_v50 }
 0x6f0   :  { %v1164_v48 = vpop.permute.xlu1 %1163  ;;  %v1108_v56 = vpop.xlane.xlu0 %1107 }
 0x6f1   :  { %v1118_v57 = vsub.f32 %v1094_v27, %v1108_v56 }
 0x6f3   :  { %v1127_v59 = vmul.f32 1.442695, %v1118_v57 }
 0x6f4   :  { %v1266_v60 = vpop.permute.xlu1 %1265  ;;  %v1105_v61 = vpop.xlane.xlu0 %1104 }
 0x6f5   :  { %3758 = vpow2.f32 %v1127_v59  ;;  %3490 = vmatpush3.msra.mxu0 %v1266_v60  ;;  %v1117_v24 = vsub.f32 %v4303_v30, %v1105_v61 }
 0x6f6   :  { %v4327_v1 = vpop.eup %3754  ;;  %3491 = vmatprep.subr.mxu0 %v3876_v55 }
 0x6f7   :  { %v1133_v7 = vsel %vm620_vm4, %v4327_v1, 0.0  ;;  %v1125_v26 = vmul.f32 1.442695, %v1117_v24 }
 0x6f8   :  { %v1264_v8 = vpop.permute.xlu1 %1263  ;;  %1134 = vadd.xlane.f32.xlu0 %v1133_v7  ;;  %v1111_v10 = vpop.xlane.xlu0 %1110 }
 0x6f9   :  { %v1119_v12 = vsub.f32 %v1095_v34, %v1111_v10  ;;  %3492 = vmatpush3.msra.mxu0 %v1264_v8 }
 0x6fa   :  { %v3757_v13 = vpop.eup %3756  ;;  %3493 = vmatprep.subr.mxu0 %v3876_v55 }
 0x6fb   :  { %v1129_v14 = vmul.f32 1.442695, %v1119_v12  ;;  %v1136_v15 = vsel %vm620_vm4, %v3757_v13, 0.0 }
 0x6fc   :  { %1137 = vadd.xlane.f32.xlu1 %v1136_v15  ;;  %v1168_v16 = vpop.permute.xlu0 %1167  ;;  %v1368_v27 = vpop.permute.xlu1 %1367 }
 0x6fd   :  { %3760 = vpow2.f32 %v1129_v14  ;;  %3475 = vmatpush3.msra.mxu1 %v1168_v16 }
 0x6fe   :  { %3476 = vmatprep.subr.mxu1 %v3876_v55  ;;  %3762 = vpow2.f32 %v1125_v26 }
 0x6ff   :  { %3477 = vmatpush3.msra.mxu1 %v1166_v52 }
 0x700   :  { %3478 = vmatprep.subr.mxu1 %v3876_v55  ;;  %v1370_v17 = vpop.permute.xlu0 %1369 }
 0x701   :  { %3479 = vmatpush3.msra.mxu1 %v1164_v48 }
 0x702   :  { %v3759_v18 = vpop.eup %3758  ;;  %3504 = vmatprep.subr.mxu1 %v3876_v55 }
 0x703   :  { %v1142_v19 = vsel %vm620_vm4, %v3759_v18, 0.0 }
 0x704   :  { %1143 = vadd.xlane.f32.xlu0 %v1142_v19  ;;  %v1262_v20 = vpop.permute.xlu0 %1261 }
 0x705   :  { %3494 = vmatpush3.msra.mxu0 %v1262_v20 }
 0x706   :  { %3519 = vmatprep.subr.mxu0 %v3876_v55 }
 0x708   :  { %v1474_v37 = vpop.permute.xlu0 %1473 }
 0x70a   :  { %v3761_v22 = vpop.eup %3760 }
 0x70b   :  { %v1145_v23 = vsel %vm620_vm4, %v3761_v22, 0.0  ;;  %v3763_v33 = vpop.eup %3762 }
 0x70c   :  { %1146 = vadd.xlane.f32.xlu0 %v1145_v23  ;;  %v1139_v30 = vsel %vm620_vm4, %v3763_v33, 0.0 }
 0x70d   :  { %1359 = vrot.lane.b32.xlu1 %v4148_v3, %s3884_s29 }
 0x711   :  { %1361 = vrot.lane.b32.xlu1 %v4133_v58, %s3884_s29 }
 0x722   :  { %1471 = vrot.lane.b32.xlu0 %v4145_v2, %s3883_s28 }
 0x726   :  { %1469 = vrot.lane.b32.xlu0 %v4152_v4, %s3883_s28 }
 0x72a   :  { %1463 = vrot.lane.b32.xlu0 %v4152_v4, %s3884_s29 }
 0x72d   :  { %v1114_v29 = vpop.xlane.xlu1 %1113 }
 0x72e   :  { %v1120_v31 = vsub.f32 %v4321_v42, %v1114_v29  ;;  %1465 = vrot.lane.b32.xlu0 %v4145_v2, %s3884_s29 }
 0x730   :  { %v1131_v32 = vmul.f32 1.442695, %v1120_v31 }
 0x731   :  { %v1366_v38 = vpop.permute.xlu1 %1365 }
 0x732   :  { %3764 = vpow2.f32 %v1131_v32 }
 0x735   :  { %1140 = vadd.xlane.f32.xlu1 %v1139_v30 }
 0x73f   :  { %v3765_v34 = vpop.eup %3764 }
 0x740   :  { %v1148_v35 = vsel %vm620_vm4, %v3765_v34, 0.0 }
 0x741   :  { %1149 = vadd.xlane.f32.xlu1 %v1148_v35 }
 0x752   :  { %1363 = vrot.lane.b32.xlu1 %v4140_v62, %s3884_s29 }
 0x756   :  { %1467 = vrot.lane.b32.xlu1 %v4142_v0, %s3884_s29 }
 0x781   :  { %v1135_v40 = vpop.xlane.xlu0 %1134 }
 0x782   :  { %3766 = vrcp.f32 %v1135_v40 }
 0x785   :  { %v1138_v42 = vpop.xlane.xlu1 %1137 }
 0x786   :  { %3768 = vrcp.f32 %v1138_v42 }
 0x789   :  { %v1360_v60 = vpop.permute.xlu1 %1359 }
 0x78d   :  { %v1144_v43 = vpop.xlane.xlu0 %1143  ;;  %v1362_v61 = vpop.permute.xlu1 %1361 }
 0x78e   :  { %3770 = vrcp.f32 %v1144_v43 }
 0x78f   :  { %v3767_v44 = vpop.eup %3766 }
 0x790   :  { %v1157_v41 = vmul.f32 %v3767_v44, %v4327_v1 }
 0x792   :  { %3481 = vmatmul.mubr.msk.f32.vlgmr.msra.gmra.mxu1 %vm620_vm4, %v1157_v41 }
 0x793   :  { %v3769_v47 = vpop.eup %3768  ;;  %3505 = vmatpush3.xpose.msk.msra.mxu1 %vm420_vm3, %v1370_v17  ;;  %3483 = vmatprep.mubr.msk.f32.mxu1 %vm3878_vm2, %v3876_v55 }
 0x794   :  { %3506 = vmatprep.subr.mxu1 %v3876_v55  ;;  %v1158_v49 = vmul.f32 %v3769_v47, %v3757_v13 }
 0x795   :  { %v1147_v39 = vpop.xlane.xlu0 %1146 }
 0x796   :  { %3772 = vrcp.f32 %v1147_v39  ;;  %3484 = vmatmul.mubr.msk.f32.gmra.mxu1 %vm620_vm4, %v1158_v49 }
 0x797   :  { %3507 = vmatpush3.xpose.msk.msra.mxu1 %vm420_vm3, %v1368_v27  ;;  %3486 = vmatprep.mubr.msk.f32.mxu1 %vm3878_vm2, %v3876_v55 }
 0x798   :  { %3508 = vmatprep.subr.mxu1 %v3876_v55 }
 0x799   :  { %v1472_v48 = vpop.permute.xlu0 %1471 }
 0x79b   :  { %v3771_v50 = vpop.eup %3770  ;;  %3509 = vmatpush3.xpose.msk.msra.mxu1 %vm420_vm3, %v1366_v38 }
 0x79c   :  { %v1160_v52 = vmul.f32 %v3771_v50, %v3759_v18  ;;  %3534 = vmatprep.subr.mxu1 %v3876_v55 }
 0x79d   :  { %v1470_v59 = vpop.permute.xlu0 %1469 }
 0x79e   :  { %3496 = vmatmul.mubr.msk.f32.vlgmr.msra.gmra.mxu0 %vm620_vm4, %v1160_v52 }
 0x79f   :  { %3520 = vmatpush3.xpose.msk.msra.mxu0 %vm420_vm3, %v1474_v37  ;;  %3498 = vmatprep.mubr.msk.f32.mxu0 %vm3878_vm2, %v3876_v55 }
 0x7a0   :  { %3521 = vmatprep.subr.mxu0 %v3876_v55 }
 0x7a1   :  { %v1464_v15 = vpop.permute.xlu0 %1463 }
 0x7a3   :  { %v3773_v56 = vpop.eup %3772  ;;  %3522 = vmatpush3.xpose.msk.msra.mxu0 %vm420_vm3, %v1472_v48 }
 0x7a4   :  { %3523 = vmatprep.subr.mxu0 %v3876_v55  ;;  %v1161_v57 = vmul.f32 %v3773_v56, %v3761_v22 }
 0x7a5   :  { %v1466_v16 = vpop.permute.xlu0 %1465 }
 0x7a6   :  { %3499 = vmatmul.mubr.msk.f32.gmra.mxu0 %vm620_vm4, %v1161_v57 }
 0x7a7   :  { %3524 = vmatpush3.xpose.msk.msra.mxu0 %vm420_vm3, %v1470_v59  ;;  %3501 = vmatprep.mubr.msk.f32.mxu0 %vm3878_vm2, %v3876_v55 }
 0x7a8   :  { %3549 = vmatprep.subr.mxu0 %v3876_v55 }
 0x7be   :  { %v1141_v1 = vpop.xlane.xlu1 %1140 }
 0x7bf   :  { %3774 = vrcp.f32 %v1141_v1 }
 0x7ca   :  { %v1150_v7 = vpop.xlane.xlu1 %1149 }
 0x7cb   :  { %3776 = vrcp.f32 %v1150_v7 }
 0x7cc   :  { %v3775_v8 = vpop.eup %3774 }
 0x7cd   :  { %v1159_v10 = vmul.f32 %v3775_v8, %v3763_v33 }
 0x7ce   :  { %v1364_v14 = vpop.permute.xlu1 %1363 }
 0x7cf   :  { %3487 = vmatmul.mubr.msk.f32.gmra.mxu1 %vm620_vm4, %v1159_v10 }
 0x7d0   :  { %3510 = vmatprep.mubr.msk.f32.mxu1 %vm3878_vm2, %v3876_v55 }
 0x7d2   :  { %v1468_v17 = vpop.permute.xlu1 %1467 }
 0x7d3   :  { %3511 = vmatmul.mubr.msk.f32.vlgmr.msra.gmra.mxu1 %vm420_vm3, %v1360_v60 }
 0x7d4   :  { %3513 = vmatprep.mubr.msk.f32.mxu1 %vm3878_vm2, %v3876_v55 }
 0x7d7   :  { %3514 = vmatmul.mubr.msk.f32.gmra.mxu1 %vm420_vm3, %v1362_v61 }
 0x7d8   :  { %v3777_v12 = vpop.eup %3776  ;;  %3516 = vmatprep.mubr.msk.f32.mxu1 %vm3878_vm2, %v3876_v55 }
 0x7d9   :  { %v1162_v13 = vmul.f32 %v3777_v12, %v3765_v34 }
 0x7db   :  { %3502 = vmatmul.mubr.msk.f32.gmra.mxu0 %vm620_vm4, %v1162_v13  ;;  %3517 = vmatmul.mubr.msk.f32.gmra.mxu1 %vm420_vm3, %v1364_v14 }
 0x7dc   :  { %3525 = vmatprep.mubr.msk.f32.mxu0 %vm3878_vm2, %v3876_v55  ;;  %3540 = vmatprep.mubr.msk.f32.mxu1 %vm3878_vm2, %v3876_v55 }
 0x7df   :  { %3526 = vmatmul.mubr.msk.f32.vlgmr.msra.gmra.mxu0 %vm420_vm3, %v1464_v15 }
 0x7e0   :  { %3528 = vmatprep.mubr.msk.f32.mxu0 %vm3878_vm2, %v3876_v55 }
 0x7e3   :  { %3529 = vmatmul.mubr.msk.f32.gmra.mxu0 %vm420_vm3, %v1466_v16 }
 0x7e4   :  { %3531 = vmatprep.mubr.msk.f32.mxu0 %vm3878_vm2, %v3876_v55 }
 0x7e7   :  { %3532 = vmatmul.mubr.msk.f32.gmra.mxu0 %vm420_vm3, %v1468_v17 }
 0x7e8   :  { %3555 = vmatprep.mubr.msk.f32.mxu0 %vm3878_vm2, %v3876_v55 }
 0x852   :  { %v4403_v18 = vpop.f32.mrf.mxu1 }
 0x854   :  { %v3482_v19 = vpop.f32.mrf.mxu1 }
 0x856   :  { %v4405_v20 = vpop.f32.mrf.mxu1 }
 0x858   :  { %v3485_v22 = vpop.f32.mrf.mxu1 }
 0x85e   :  { %v4407_v23 = vpop.f32.mrf.mxu0 }
 0x860   :  { %v3497_v24 = vpop.f32.mrf.mxu0 }
 0x866   :  { %v4409_v26 = vpop.f32.mrf.mxu0 }
 0x868   :  { %v3500_v27 = vpop.f32.mrf.mxu0 }
 0x88f   :  { %v4411_v29 = vpop.f32.mrf.mxu1 }
 0x891   :  { %v3488_v31 = vpop.f32.mrf.mxu1 }
 0x893   :  { %v1449_v32 = vpop.f32.mrf.mxu1 }
 0x894   :  { %v1567_v33 = vmul.f32 0.35355338, %v1449_v32 }
 0x895   :  { %v3512_v30 = vpop.f32.mrf.mxu1 }
 0x896   :  { %v1573_v34 = vsel %vm620_vm4, %v1567_v33, -inf }
 0x897   :  { %1574 = vmax.xlane.f32.xlu0 %v1573_v34  ;;  %v1454_v35 = vpop.f32.mrf.mxu1 }
 0x898   :  { %v1568_v37 = vmul.f32 0.35355338, %v1454_v35 }
 0x899   :  { %v3515_v38 = vpop.f32.mrf.mxu1 }
 0x89a   :  { %v1576_v40 = vsel %vm620_vm4, %v1568_v37, -inf }
 0x89b   :  { %1577 = vmax.xlane.f32.xlu1 %v1576_v40  ;;  %v4415_v42 = vpop.f32.mrf.mxu0  ;;  %v1459_v43 = vpop.f32.mrf.mxu1 }
 0x89c   :  { %v4417_v50 = vmul.f32 0.35355338, %v1459_v43 }
 0x89d   :  { %v3503_v44 = vpop.f32.mrf.mxu0  ;;  %v3518_v41 = vpop.f32.mrf.mxu1 }
 0x89e   :  { %v1579_v59 = vsel %vm620_vm4, %v4417_v50, -inf }
 0x89f   :  { %v1553_v47 = vpop.f32.mrf.mxu0 }
 0x8a0   :  { %v1570_v49 = vmul.f32 0.35355338, %v1553_v47 }
 0x8a1   :  { %v3527_v39 = vpop.f32.mrf.mxu0 }
 0x8a2   :  { %v1582_v52 = vsel %vm620_vm4, %v1570_v49, -inf }
 0x8a3   :  { %1583 = vmax.xlane.f32.xlu0 %v1582_v52  ;;  %v1558_v48 = vpop.f32.mrf.mxu0 }
 0x8a4   :  { %v1571_v57 = vmul.f32 0.35355338, %v1558_v48 }
 0x8a5   :  { %v3530_v56 = vpop.f32.mrf.mxu0 }
 0x8a6   :  { %v1585_v1 = vsel %vm620_vm4, %v1571_v57, -inf }
 0x8a7   :  { %1580 = vmax.xlane.f32.xlu0 %v1579_v59  ;;  %v1563_v60 = vpop.f32.mrf.mxu0 }
 0x8a8   :  { %v4435_v7 = vmul.f32 0.35355338, %v1563_v60 }
 0x8a9   :  { %v3533_v61 = vpop.f32.mrf.mxu0 }
 0x8aa   :  { %v1588_v8 = vsel %vm620_vm4, %v4435_v7, -inf }
 0x8ab   :  { %1586 = vmax.xlane.f32.xlu0 %v1585_v1 }
 0x8ac   :  { %1641 = vrot.lane.b32.xlu1 %v4133_v58, %s3885_s30 }
 0x8b0   :  { %1639 = vrot.lane.b32.xlu1 %v4148_v3, %s3885_s30 }
 0x8b4   :  { %1741 = vrot.lane.b32.xlu1 %v4142_v0, %s3885_s30 }
 0x8b8   :  { %1739 = vrot.lane.b32.xlu1 %v4145_v2, %s3885_s30 }
 0x8bc   :  { %1843 = vrot.lane.b32.xlu1 %v4133_v58, %s3886_s4 }
 0x8c1   :  { %1643 = vrot.lane.b32.xlu0 %v4140_v62, %s3885_s30 }
 0x8c5   :  { %1845 = vrot.lane.b32.xlu0 %v4140_v62, %s3886_s4 }
 0x8c9   :  { %1737 = vrot.lane.b32.xlu0 %v4152_v4, %s3885_s30 }
 0x8cd   :  { %1949 = vrot.lane.b32.xlu0 %v4142_v0, %s3886_s4 }
 0x8e0   :  { %1589 = vmax.xlane.f32.xlu1 %v1588_v8 }
 0x8f1   :  { %1841 = vrot.lane.b32.xlu1 %v4148_v3, %s3886_s4 }
 0x920   :  { %v1575_v10 = vpop.xlane.xlu0 %1574 }
 0x921   :  { %v1591_v12 = vsub.f32 %v1567_v33, %v1575_v10 }
 0x923   :  { %v1597_v13 = vmul.f32 1.442695, %v1591_v12 }
 0x924   :  { %v1578_v14 = vpop.xlane.xlu1 %1577 }
 0x925   :  { %3778 = vpow2.f32 %v1597_v13  ;;  %v1592_v15 = vsub.f32 %v1568_v37, %v1578_v14 }
 0x927   :  { %v1599_v16 = vmul.f32 1.442695, %v1592_v15 }
 0x928   :  { %v1642_v17 = vpop.permute.xlu1 %1641 }
 0x929   :  { %3780 = vpow2.f32 %v1599_v16 }
 0x92c   :  { %v1640_v19 = vpop.permute.xlu1 %1639  ;;  %v1584_v22 = vpop.xlane.xlu0 %1583 }
 0x92d   :  { %v1594_v24 = vsub.f32 %v1570_v49, %v1584_v22 }
 0x92f   :  { %v1603_v27 = vmul.f32 1.442695, %v1594_v24 }
 0x930   :  { %v1742_v31 = vpop.permute.xlu1 %1741  ;;  %v1581_v32 = vpop.xlane.xlu0 %1580 }
 0x931   :  { %3782 = vpow2.f32 %v1603_v27  ;;  %3550 = vmatpush3.msra.mxu0 %v1742_v31  ;;  %v1593_v56 = vsub.f32 %v4417_v50, %v1581_v32 }
 0x932   :  { %v4441_v30 = vpop.eup %3778  ;;  %3551 = vmatprep.subr.mxu0 %v3876_v55 }
 0x933   :  { %v1609_v33 = vsel %vm620_vm4, %v4441_v30, 0.0 }
 0x934   :  { %v1740_v34 = vpop.permute.xlu1 %1739  ;;  %1610 = vadd.xlane.f32.xlu0 %v1609_v33  ;;  %v1587_v35 = vpop.xlane.xlu0 %1586 }
 0x935   :  { %v1595_v37 = vsub.f32 %v1571_v57, %v1587_v35  ;;  %3552 = vmatpush3.msra.mxu0 %v1740_v34  ;;  %v1601_v57 = vmul.f32 1.442695, %v1593_v56 }
 0x936   :  { %v3781_v38 = vpop.eup %3780  ;;  %3553 = vmatprep.subr.mxu0 %v3876_v55 }
 0x937   :  { %v1605_v40 = vmul.f32 1.442695, %v1595_v37  ;;  %v1612_v43 = vsel %vm620_vm4, %v3781_v38, 0.0 }
 0x938   :  { %1613 = vadd.xlane.f32.xlu1 %v1612_v43  ;;  %v1644_v44 = vpop.permute.xlu0 %1643  ;;  %v1844_v59 = vpop.permute.xlu1 %1843 }
 0x939   :  { %3784 = vpow2.f32 %v1605_v40  ;;  %3535 = vmatpush3.msra.mxu1 %v1644_v44 }
 0x93a   :  { %3536 = vmatprep.subr.mxu1 %v3876_v55  ;;  %3786 = vpow2.f32 %v1601_v57 }
 0x93b   :  { %3537 = vmatpush3.msra.mxu1 %v1642_v17 }
 0x93c   :  { %3538 = vmatprep.subr.mxu1 %v3876_v55  ;;  %v1846_v41 = vpop.permute.xlu0 %1845 }
 0x93d   :  { %3539 = vmatpush3.msra.mxu1 %v1640_v19 }
 0x93e   :  { %v3783_v47 = vpop.eup %3782  ;;  %3564 = vmatprep.subr.mxu1 %v3876_v55 }
 0x93f   :  { %v1618_v49 = vsel %vm620_vm4, %v3783_v47, 0.0 }
 0x940   :  { %1619 = vadd.xlane.f32.xlu0 %v1618_v49  ;;  %v1738_v39 = vpop.permute.xlu0 %1737 }
 0x941   :  { %3554 = vmatpush3.msra.mxu0 %v1738_v39 }
 0x942   :  { %3579 = vmatprep.subr.mxu0 %v3876_v55 }
 0x944   :  { %v1950_v13 = vpop.permute.xlu0 %1949 }
 0x946   :  { %v3785_v52 = vpop.eup %3784 }
 0x947   :  { %v1621_v48 = vsel %vm620_vm4, %v3785_v52, 0.0  ;;  %v3787_v8 = vpop.eup %3786 }
 0x948   :  { %1622 = vadd.xlane.f32.xlu0 %v1621_v48  ;;  %v1615_v50 = vsel %vm620_vm4, %v3787_v8, 0.0 }
 0x949   :  { %1835 = vrot.lane.b32.xlu1 %v4148_v3, %s3887_s0 }
 0x94d   :  { %1837 = vrot.lane.b32.xlu1 %v4133_v58, %s3887_s0 }
 0x95e   :  { %1947 = vrot.lane.b32.xlu0 %v4145_v2, %s3886_s4 }
 0x962   :  { %1945 = vrot.lane.b32.xlu0 %v4152_v4, %s3886_s4 }
 0x966   :  { %1939 = vrot.lane.b32.xlu0 %v4152_v4, %s3887_s0 }
 0x969   :  { %v1590_v60 = vpop.xlane.xlu1 %1589 }
 0x96a   :  { %v1596_v61 = vsub.f32 %v4435_v7, %v1590_v60  ;;  %1941 = vrot.lane.b32.xlu0 %v4145_v2, %s3887_s0 }
 0x96c   :  { %v1607_v1 = vmul.f32 1.442695, %v1596_v61 }
 0x96d   :  { %v1842_v14 = vpop.permute.xlu1 %1841 }
 0x96e   :  { %3788 = vpow2.f32 %v1607_v1 }
 0x971   :  { %1616 = vadd.xlane.f32.xlu1 %v1615_v50 }
 0x97b   :  { %v3789_v10 = vpop.eup %3788 }
 0x97c   :  { %v1624_v12 = vsel %vm620_vm4, %v3789_v10, 0.0 }
 0x97d   :  { %1625 = vadd.xlane.f32.xlu1 %v1624_v12 }
 0x98e   :  { %1839 = vrot.lane.b32.xlu1 %v4140_v62, %s3887_s0 }
 0x992   :  { %1943 = vrot.lane.b32.xlu1 %v4142_v0, %s3887_s0 }
 0x9bd   :  { %v1611_v15 = vpop.xlane.xlu0 %1610 }
 0x9be   :  { %3790 = vrcp.f32 %v1611_v15 }
 0x9c1   :  { %v1614_v7 = vpop.xlane.xlu1 %1613 }
 0x9c2   :  { %3792 = vrcp.f32 %v1614_v7 }
 0x9c5   :  { %v1836_v37 = vpop.permute.xlu1 %1835 }
 0x9c9   :  { %v1620_v16 = vpop.xlane.xlu0 %1619 }
 0x9ca   :  { %3794 = vrcp.f32 %v1620_v16 }
 0x9cb   :  { %v3791_v17 = vpop.eup %3790 }
 0x9cc   :  { %v1633_v19 = vmul.f32 %v3791_v17, %v4441_v30 }
 0x9ce   :  { %3541 = vmatmul.mubr.msk.f32.vlgmr.msra.gmra.mxu1 %vm620_vm4, %v1633_v19 }
 0x9cf   :  { %v3793_v22 = vpop.eup %3792  ;;  %3565 = vmatpush3.xpose.msk.msra.mxu1 %vm420_vm3, %v1846_v41  ;;  %3543 = vmatprep.mubr.msk.f32.mxu1 %vm3878_vm2, %v3876_v55 }
 0x9d0   :  { %3566 = vmatprep.subr.mxu1 %v3876_v55  ;;  %v1634_v24 = vmul.f32 %v3793_v22, %v3781_v38  ;;  %v1838_v38 = vpop.permute.xlu1 %1837 }
 0x9d1   :  { %v1623_v27 = vpop.xlane.xlu0 %1622 }
 0x9d2   :  { %3796 = vrcp.f32 %v1623_v27  ;;  %3544 = vmatmul.mubr.msk.f32.gmra.mxu1 %vm620_vm4, %v1634_v24 }
 0x9d3   :  { %3567 = vmatpush3.xpose.msk.msra.mxu1 %vm420_vm3, %v1844_v59  ;;  %3546 = vmatprep.mubr.msk.f32.mxu1 %vm3878_vm2, %v3876_v55 }
 0x9d4   :  { %3568 = vmatprep.subr.mxu1 %v3876_v55 }
 0x9d5   :  { %v1948_v30 = vpop.permute.xlu0 %1947 }
 0x9d7   :  { %v3795_v31 = vpop.eup %3794  ;;  %3569 = vmatpush3.xpose.msk.msra.mxu1 %vm420_vm3, %v1842_v14 }
 0x9d8   :  { %v1636_v32 = vmul.f32 %v3795_v31, %v3783_v47  ;;  %3694 = vmatprep.subr.mxu1 %v3876_v55 }
 0x9d9   :  { %v1946_v35 = vpop.permute.xlu0 %1945 }
 0x9da   :  { %3556 = vmatmul.mubr.msk.f32.vlgmr.msra.gmra.mxu0 %vm620_vm4, %v1636_v32 }
 0x9db   :  { %3580 = vmatpush3.xpose.msk.msra.mxu0 %vm420_vm3, %v1950_v13  ;;  %3558 = vmatprep.mubr.msk.f32.mxu0 %vm3878_vm2, %v3876_v55 }
 0x9dc   :  { %3581 = vmatprep.subr.mxu0 %v3876_v55 }
 0x9df   :  { %v3797_v33 = vpop.eup %3796  ;;  %3582 = vmatpush3.xpose.msk.msra.mxu0 %vm420_vm3, %v1948_v30 }
 0x9e0   :  { %3583 = vmatprep.subr.mxu0 %v3876_v55  ;;  %v1637_v34 = vmul.f32 %v3797_v33, %v3785_v52  ;;  %v1940_v52 = vpop.permute.xlu0 %1939 }
 0x9e2   :  { %3559 = vmatmul.mubr.msk.f32.gmra.mxu0 %vm620_vm4, %v1637_v34 }
 0x9e3   :  { %3584 = vmatpush3.xpose.msk.msra.mxu0 %vm420_vm3, %v1946_v35  ;;  %3561 = vmatprep.mubr.msk.f32.mxu0 %vm3878_vm2, %v3876_v55 }
 0x9e4   :  { %3594 = vmatprep.subr.mxu0 %v3876_v55  ;;  %v1942_v48 = vpop.permute.xlu0 %1941 }
 0x9fa   :  { %v1617_v40 = vpop.xlane.xlu1 %1616 }
 0x9fb   :  { %3798 = vrcp.f32 %v1617_v40 }
 0xa06   :  { %v1626_v43 = vpop.xlane.xlu1 %1625 }
 0xa07   :  { %3800 = vrcp.f32 %v1626_v43 }
 0xa08   :  { %v3799_v44 = vpop.eup %3798 }
 0xa09   :  { %v1635_v41 = vmul.f32 %v3799_v44, %v3787_v8 }
 0xa0a   :  { %v1840_v39 = vpop.permute.xlu1 %1839 }
 0xa0b   :  { %3547 = vmatmul.mubr.msk.f32.gmra.mxu1 %vm620_vm4, %v1635_v41 }
 0xa0c   :  { %3570 = vmatprep.mubr.msk.f32.mxu1 %vm3878_vm2, %v3876_v55 }
 0xa0e   :  { %v1944_v56 = vpop.permute.xlu1 %1943 }
 0xa0f   :  { %3571 = vmatmul.mubr.msk.f32.vlgmr.msra.gmra.mxu1 %vm420_vm3, %v1836_v37 }
 0xa10   :  { %3573 = vmatprep.mubr.msk.f32.mxu1 %vm3878_vm2, %v3876_v55 }
 0xa13   :  { %3574 = vmatmul.mubr.msk.f32.gmra.mxu1 %vm420_vm3, %v1838_v38 }
 0xa14   :  { %v3801_v47 = vpop.eup %3800  ;;  %3576 = vmatprep.mubr.msk.f32.mxu1 %vm3878_vm2, %v3876_v55 }
 0xa15   :  { %v1638_v49 = vmul.f32 %v3801_v47, %v3789_v10 }
 0xa17   :  { %3562 = vmatmul.mubr.msk.f32.gmra.mxu0 %vm620_vm4, %v1638_v49  ;;  %3577 = vmatmul.mubr.msk.f32.gmra.mxu1 %vm420_vm3, %v1840_v39 }
 0xa18   :  { %3585 = vmatprep.mubr.msk.f32.mxu0 %vm3878_vm2, %v3876_v55  ;;  %3603 = vmatprep.mubr.msk.f32.mxu1 %vm3878_vm2, %v3876_v55 }
 0xa1b   :  { %3586 = vmatmul.mubr.msk.f32.vlgmr.msra.gmra.mxu0 %vm420_vm3, %v1940_v52 }
 0xa1c   :  { %3588 = vmatprep.mubr.msk.f32.mxu0 %vm3878_vm2, %v3876_v55 }
 0xa1f   :  { %3589 = vmatmul.mubr.msk.f32.gmra.mxu0 %vm420_vm3, %v1942_v48 }
 0xa20   :  { %3591 = vmatprep.mubr.msk.f32.mxu0 %vm3878_vm2, %v3876_v55 }
 0xa23   :  { %3592 = vmatmul.mubr.msk.f32.gmra.mxu0 %vm420_vm3, %v1944_v56 }
 0xa24   :  { %3600 = vmatprep.mubr.msk.f32.mxu0 %vm3878_vm2, %v3876_v55 }
 0xa8e   :  { %v4517_v57 = vpop.f32.mrf.mxu1 }
 0xa90   :  { %v3542_v59 = vpop.f32.mrf.mxu1 }
 0xa92   :  { %v4519_v60 = vpop.f32.mrf.mxu1 }
 0xa94   :  { %v3545_v61 = vpop.f32.mrf.mxu1 }
 0xa9a   :  { %v4521_v1 = vpop.f32.mrf.mxu0 }
 0xa9c   :  { %v3557_v8 = vpop.f32.mrf.mxu0 }
 0xaa2   :  { %v4523_v50 = vpop.f32.mrf.mxu0 }
 0xaa4   :  { %v3560_v10 = vpop.f32.mrf.mxu0 }
 0xacb   :  { %v4525_v12 = vpop.f32.mrf.mxu1 }
 0xacd   :  { %v3548_v13 = vpop.f32.mrf.mxu1 }
 0xacf   :  { %v1925_v14 = vpop.f32.mrf.mxu1 }
 0xad0   :  { %v2043_v15 = vmul.f32 0.35355338, %v1925_v14 }
 0xad1   :  { %v3572_v7 = vpop.f32.mrf.mxu1 }
 0xad2   :  { %v2049_v16 = vsel %vm620_vm4, %v2043_v15, -inf }
 0xad3   :  { %2050 = vmax.xlane.f32.xlu0 %v2049_v16  ;;  %v1930_v17 = vpop.f32.mrf.mxu1 }
 0xad4   :  { %v2044_v19 = vmul.f32 0.35355338, %v1930_v17 }
 0xad5   :  { %v3575_v22 = vpop.f32.mrf.mxu1 }
 0xad6   :  { %v2052_v24 = vsel %vm620_vm4, %v2044_v19, -inf }
 0xad7   :  { %2053 = vmax.xlane.f32.xlu1 %v2052_v24  ;;  %v4529_v27 = vpop.f32.mrf.mxu0  ;;  %v1935_v31 = vpop.f32.mrf.mxu1 }
 0xad8   :  { %v2045_v37 = vmul.f32 0.35355338, %v1935_v31 }
 0xad9   :  { %v3563_v32 = vpop.f32.mrf.mxu0  ;;  %v3578_v30 = vpop.f32.mrf.mxu1 }
 0xada   :  { %v2055_v41 = vsel %vm620_vm4, %v2045_v37, -inf }
 0xadb   :  { %v2029_v33 = vpop.f32.mrf.mxu0 }
 0xadc   :  { %v2046_v34 = vmul.f32 0.35355338, %v2029_v33 }
 0xadd   :  { %v3587_v35 = vpop.f32.mrf.mxu0 }
 0xade   :  { %v2058_v38 = vsel %vm620_vm4, %v2046_v34, -inf }
 0xadf   :  { %2059 = vmax.xlane.f32.xlu0 %v2058_v38  ;;  %v2034_v40 = vpop.f32.mrf.mxu0 }
 0xae0   :  { %v2047_v44 = vmul.f32 0.35355338, %v2034_v40 }
 0xae1   :  { %v3590_v43 = vpop.f32.mrf.mxu0 }
 0xae2   :  { %v2061_v52 = vsel %vm620_vm4, %v2047_v44, -inf }
 0xae3   :  { %2056 = vmax.xlane.f32.xlu0 %v2055_v41  ;;  %v2039_v47 = vpop.f32.mrf.mxu0 }
 0xae4   :  { %v2048_v49 = vmul.f32 0.35355338, %v2039_v47 }
 0xae5   :  { %v3593_v39 = vpop.f32.mrf.mxu0 }
 0xae6   :  { %v2064_v48 = vsel %vm620_vm4, %v2048_v49, -inf }
 0xae7   :  { %2062 = vmax.xlane.f32.xlu0 %v2061_v52  ;;  %2065 = vmax.xlane.f32.xlu1 %v2064_v48 }
 0xaf8   :  { %2117 = vrot.lane.b32.xlu1 %v4133_v58, %s3888_s19 }
 0xafc   :  { %2115 = vrot.lane.b32.xlu1 %v4148_v3, %s3888_s19 }
 0xafd   :  { %2119 = vrot.lane.b32.xlu0 %v4140_v62, %s3888_s19 }
 0xb00   :  { %2217 = vrot.lane.b32.xlu1 %v4142_v0, %s3888_s19 }
 0xb5c   :  { %v2051_v56 = vpop.xlane.xlu0 %2050 }
 0xb5d   :  { %v2067_v59 = vsub.f32 %v2043_v15, %v2051_v56 }
 0xb5f   :  { %v2073_v61 = vmul.f32 1.442695, %v2067_v59 }
 0xb60   :  { %v2054_v8 = vpop.xlane.xlu1 %2053 }
 0xb61   :  { %3802 = vpow2.f32 %v2073_v61  ;;  %v2068_v10 = vsub.f32 %v2044_v19, %v2054_v8 }
 0xb63   :  { %v2075_v13 = vmul.f32 1.442695, %v2068_v10 }
 0xb65   :  { %3804 = vpow2.f32 %v2075_v13  ;;  %v2405_v13 = vld [vmem:[%s4793_s8 + $0x18] sm:$0xff] }
 0xb68   :  { %v2060_v14 = vpop.xlane.xlu0 %2059 }
 0xb69   :  { %v2070_v7 = vsub.f32 %v2046_v34, %v2060_v14  ;;  %v2404_v14 = vld [vmem:[%s4793_s8 + $0x10] sm:$0xff] }
 0xb6b   :  { %v2079_v58 = vmul.f32 1.442695, %v2070_v7  ;;  %v2403_v7 = vld [vmem:[%s4793_s8 + $0x8] sm:$0xff] }
 0xb6c   :  { %v2057_v16 = vpop.xlane.xlu0 %2056 }
 0xb6d   :  { %3806 = vpow2.f32 %v2079_v58  ;;  %v2069_v3 = vsub.f32 %v2045_v37, %v2057_v16 }
 0xb6e   :  { %v4543_v17 = vpop.eup %3802 }
 0xb6f   :  { %v2077_v62 = vmul.f32 1.442695, %v2069_v3  ;;  %v2085_v0 = vsel %vm620_vm4, %v4543_v17, 0.0 }
 0xb70   :  { %v2066_v22 = vpop.xlane.xlu1 %2065  ;;  %2086 = vadd.xlane.f32.xlu0 %v2085_v0  ;;  %v2063_v15 = vpop.xlane.xlu0 %2062 }
 0xb71   :  { %3808 = vpow2.f32 %v2077_v62  ;;  %v2072_v24 = vsub.f32 %v2048_v49, %v2066_v22  ;;  %v2071_v19 = vsub.f32 %v2047_v44, %v2063_v15 }
 0xb72   :  { %v4547_v31 = vpop.eup %3804 }
 0xb73   :  { %v2083_v32 = vmul.f32 1.442695, %v2072_v24  ;;  %v2081_v30 = vmul.f32 1.442695, %v2071_v19  ;;  %v2088_v33 = vsel %vm620_vm4, %v4547_v31, 0.0 }
 0xb74   :  { %2089 = vadd.xlane.f32.xlu1 %v2088_v33  ;;  %v2118_v34 = vpop.permute.xlu1 %2117  ;;  %v2120_v35 = vpop.permute.xlu0 %2119 }
 0xb75   :  { %3810 = vpow2.f32 %v2083_v32  ;;  %3595 = vmatpush3.msra.mxu0 %v2120_v35  ;;  %3697 = vmatpush3.msra.mxu1 %v2120_v35 }
 0xb76   :  { %3812 = vpow2.f32 %v2081_v30  ;;  %3596 = vmatprep.subr.mxu0 %v3876_v55  ;;  %3695 = vmatprep.subr.mxu1 %v3876_v55 }
 0xb77   :  { %3597 = vmatpush3.msra.mxu0 %v2118_v34  ;;  %3698 = vmatpush3.msra.mxu1 %v2118_v34 }
 0xb78   :  { %v2116_v37 = vpop.permute.xlu1 %2115  ;;  %3598 = vmatprep.subr.mxu0 %v3876_v55  ;;  %3696 = vmatprep.subr.mxu1 %v3876_v55 }
 0xb79   :  { %3599 = vmatpush3.msra.mxu0 %v2116_v37  ;;  %3699 = vmatpush3.msra.mxu1 %v2116_v37 }
 0xb7a   :  { %v3807_v38 = vpop.eup %3806  ;;  %3609 = vmatprep.subr.mxu0 %v3876_v55  ;;  %3624 = vmatprep.subr.mxu1 %v2405_v13 }
 0xb7b   :  { %v2094_v40 = vsel %vm620_vm4, %v3807_v38, 0.0 }
 0xb7c   :  { %2095 = vadd.xlane.f32.xlu0 %v2094_v40 }
 0xb7e   :  { %v3809_v43 = vpop.eup %3808 }
 0xb7f   :  { %v2091_v44 = vsel %vm620_vm4, %v3809_v43, 0.0 }
 0xb80   :  { %2092 = vadd.xlane.f32.xlu1 %v2091_v44 }
 0xb82   :  { %v3811_v41 = vpop.eup %3810 }
 0xb83   :  { %v3813_v47 = vpop.eup %3812  ;;  %v2100_v49 = vsel %vm620_vm4, %v3811_v41, 0.0 }
 0xb84   :  { %2101 = vadd.xlane.f32.xlu1 %v2100_v49  ;;  %v2097_v39 = vsel %vm620_vm4, %v3813_v47, 0.0 }
 0xb85   :  { %2098 = vadd.xlane.f32.xlu0 %v2097_v39 }
 0xb95   :  { %2213 = vrot.lane.b32.xlu1 %v4152_v4, %s3888_s19 }
 0xb99   :  { %2319 = vrot.lane.b32.xlu1 %v4405_v20, %s3889_s3 }
 0xb9b   :  { %2215 = vrot.lane.b32.xlu0 %v4145_v2, %s3888_s19  ;;  %v2218_v2 = vpop.permute.xlu1 %2217 }
 0xb9d   :  { %2343 = vrot.lane.b32.xlu1 %v4519_v60, %s3890_s1 }
 0xb9f   :  { %2317 = vrot.lane.b32.xlu0 %v4403_v18, %s3889_s3 }
 0xba1   :  { %2323 = vrot.lane.b32.xlu1 %v4407_v23, %s3889_s3 }
 0xba3   :  { %2341 = vrot.lane.b32.xlu0 %v4517_v57, %s3890_s1 }
 0xba5   :  { %2347 = vrot.lane.b32.xlu1 %v4521_v1, %s3890_s1 }
 0xba7   :  { %2321 = vrot.lane.b32.xlu0 %v4411_v29, %s3889_s3 }
 0xba9   :  { %2327 = vrot.lane.b32.xlu1 %v4415_v42, %s3889_s3 }
 0xbab   :  { %2345 = vrot.lane.b32.xlu0 %v4525_v12, %s3890_s1 }
 0xbad   :  { %2351 = vrot.lane.b32.xlu1 %v4529_v27, %s3890_s1 }
 0xbaf   :  { %2325 = vrot.lane.b32.xlu0 %v4409_v26, %s3889_s3 }
 0xbb3   :  { %2349 = vrot.lane.b32.xlu0 %v4523_v50, %s3890_s1 }
 0xbf9   :  { %v2087_v4 = vpop.xlane.xlu0 %2086 }
 0xbfa   :  { %3814 = vrcp.f32 %v2087_v4 }
 0xbfd   :  { %v2090_v18 = vpop.xlane.xlu1 %2089 }
 0xbfe   :  { %3816 = vrcp.f32 %v2090_v18 }
 0xc05   :  { %v2096_v20 = vpop.xlane.xlu0 %2095 }
 0xc06   :  { %3818 = vrcp.f32 %v2096_v20 }
 0xc07   :  { %v3815_v23 = vpop.eup %3814 }
 0xc08   :  { %v2109_v29 = vmul.f32 %v3815_v23, %v4543_v17 }
 0xc09   :  { %v2093_v42 = vpop.xlane.xlu1 %2092 }
 0xc0a   :  { %3820 = vrcp.f32 %v2093_v42  ;;  %3601 = vmatmul.mubr.msk.f32.vlgmr.msra.gmra.mxu0 %vm620_vm4, %v2109_v29 }
 0xc0b   :  { %v3817_v57 = vpop.eup %3816  ;;  %3610 = vmatpush3.msra.mxu0 %v2218_v2  ;;  %3615 = vmatprep.mubr.msk.f32.mxu0 %vm3878_vm2, %v3876_v55 }
 0xc0c   :  { %v2110_v26 = vmul.f32 %v3817_v57, %v4547_v31  ;;  %3611 = vmatprep.subr.mxu0 %v3876_v55 }
 0xc0d   :  { %v2102_v60 = vpop.xlane.xlu1 %2101 }
 0xc0e   :  { %v2099_v1 = vpop.xlane.xlu0 %2098  ;;  %3604 = vmatmul.mubr.msk.f32.vlgmr.msra.gmra.mxu1 %vm620_vm4, %v2110_v26 }
 0xc0f   :  { %3822 = vrcp.f32 %v2099_v1  ;;  %3606 = vmatprep.mubr.msk.f32.mxu1 %vm3878_vm2, %v3876_v55  ;;  %3625 = vmatpush3.msra.mxu1 %v2405_v13 }
 0xc10   :  { %3824 = vrcp.f32 %v2102_v60  ;;  %3626 = vmatprep.subr.mxu1 %v2404_v14 }
 0xc11   :  { %v2214_v27 = vpop.permute.xlu1 %2213  ;;  %3627 = vmatpush3.msra.mxu1 %v2404_v14 }
 0xc12   :  { %v2216_v50 = vpop.permute.xlu0 %2215  ;;  %3628 = vmatprep.subr.mxu1 %v2403_v7 }
 0xc13   :  { %v3819_v12 = vpop.eup %3818  ;;  %3612 = vmatpush3.msra.mxu0 %v2216_v50  ;;  %3629 = vmatpush3.msra.mxu1 %v2403_v7 }
 0xc14   :  { %3613 = vmatprep.subr.mxu0 %v3876_v55  ;;  %v2112_v52 = vmul.f32 %v3819_v12, %v3807_v38 }
 0xc15   :  { %3614 = vmatpush3.msra.mxu0 %v2214_v27  ;;  %v2320_v33 = vpop.permute.xlu1 %2319 }
 0xc16   :  { %3616 = vmatmul.mubr.msk.f32.vlgmr.msra.gmra.mxu0 %vm620_vm4, %v2112_v52  ;;  %v2318_v30 = vpop.permute.xlu0 %2317  ;;  %v2384_v20 = vsel %vm420_vm3, %v4291_v5, %v2320_v33 }
 0xc17   :  { %v3821_v48 = vpop.eup %3820  ;;  %3618 = vmatprep.mubr.msk.f32.mxu0 %vm3878_vm2, %v3876_v55  ;;  %v2383_v49 = vsel %vm420_vm3, %v4289_v63, %v2318_v30 }
 0xc18   :  { %v2111_v56 = vmul.f32 %v3821_v48, %v3809_v43 }
 0xc19   :  { %v2344_v35 = vpop.permute.xlu1 %2343 }
 0xc1a   :  { %3607 = vmatmul.mubr.msk.f32.gmra.mxu1 %vm620_vm4, %v2111_v56  ;;  %v2342_v34 = vpop.permute.xlu0 %2341  ;;  %v2391_v23 = vsel %vm2389_vm5, %v2384_v20, %v2344_v35 }
 0xc1b   :  { %v2390_v39 = vsel %vm2389_vm5, %v2383_v49, %v2342_v34 }
 0xc1c   :  { %v3823_v59 = vpop.eup %3822 }
 0xc1d   :  { %v2113_v61 = vmul.f32 %v3823_v59, %v3813_v47  ;;  %v3825_v8 = vpop.eup %3824  ;;  %v2324_v38 = vpop.permute.xlu1 %2323 }
 0xc1e   :  { %v2114_v10 = vmul.f32 %v3825_v8, %v3811_v41  ;;  %v2322_v37 = vpop.permute.xlu0 %2321  ;;  %v2386_v26 = vsel %vm420_vm3, %v4293_v6, %v2324_v38 }
 0xc1f   :  { %3619 = vmatmul.mubr.msk.f32.gmra.mxu0 %vm620_vm4, %v2113_v61  ;;  %v2385_v63 = vsel %vm420_vm3, %v4297_v11, %v2322_v37 }
 0xc20   :  { %3621 = vmatprep.mubr.msk.f32.mxu0 %vm3878_vm2, %v3876_v55  ;;  %v2402_v55 = vld [vmem:[%s4793_s8] sm:$0xff] }
 0xc21   :  { %3630 = vmatprep.subr.mxu1 %v2402_v55  ;;  %v2348_v43 = vpop.permute.xlu1 %2347 }
 0xc22   :  { %3631 = vmatpush3.msra.mxu1 %v2402_v55  ;;  %v2346_v40 = vpop.permute.xlu0 %2345  ;;  %v2393_v50 = vsel %vm2389_vm5, %v2386_v26, %v2348_v43 }
 0xc23   :  { %3622 = vmatmul.mubr.msk.f32.gmra.mxu0 %vm620_vm4, %v2114_v10  ;;  %v2392_v60 = vsel %vm2389_vm5, %v2385_v63, %v2346_v40 }
 0xc25   :  { %v2328_v41 = vpop.permute.xlu1 %2327 }
 0xc26   :  { %v2326_v44 = vpop.permute.xlu0 %2325  ;;  %v2388_v48 = vsel %vm420_vm3, %v4301_v21, %v2328_v41 }
 0xc27   :  { %v2387_v11 = vsel %vm420_vm3, %v4295_v9, %v2326_v44  ;;  %v3169_v9 = vld [vmem:[%s4794_s9] ss:$0 sm:$0xff] }
 0xc29   :  { %v2352_v2 = vpop.permute.xlu1 %2351 }
 0xc2a   :  { %v2350_v47 = vpop.permute.xlu0 %2349  ;;  %v2395_v56 = vsel %vm2389_vm5, %v2388_v48, %v2352_v2  ;;  %v2631_v48 = vld [vmem:[%s4796_s11] sm:$0xff] }
 0xc2b   :  { %v2394_v27 = vsel %vm2389_vm5, %v2387_v11, %v2350_v47 }
 0xcca   :  { %v2199_v58 = vpop.f32.mrf.mxu0 }
 0xccb   :  { %2365 = vrot.lane.b32.xlu0 %v2199_v58, %s3891_s7 }
 0xccc   :  { %v3602_v16 = vpop.f32.mrf.mxu0 }
 0xcce   :  { %v2204_v3 = vpop.f32.mrf.mxu1 }
 0xccf   :  { %2367 = vrot.lane.b32.xlu1 %v2204_v3, %s3891_s7 }
 0xcd0   :  { %v3605_v17 = vpop.f32.mrf.mxu1 }
 0xcd6   :  { %v2297_v62 = vpop.f32.mrf.mxu0 }
 0xcd7   :  { %2371 = vrot.lane.b32.xlu1 %v2297_v62, %s3891_s7 }
 0xcd8   :  { %v3617_v0 = vpop.f32.mrf.mxu0 }
 0xcda   :  { %v2209_v22 = vpop.f32.mrf.mxu1 }
 0xcdb   :  { %2369 = vrot.lane.b32.xlu0 %v2209_v22, %s3891_s7 }
 0xcdc   :  { %v3608_v15 = vpop.f32.mrf.mxu1 }
 0xcdf   :  { %v2302_v24 = vpop.f32.mrf.mxu0 }
 0xce0   :  { %2373 = vrot.lane.b32.xlu0 %v2302_v24, %s3891_s7 }
 0xce1   :  { %v3620_v19 = vpop.f32.mrf.mxu0 }
 0xce3   :  { %v2307_v31 = vpop.f32.mrf.mxu0 }
 0xce4   :  { %2375 = vrot.lane.b32.xlu1 %v2307_v31, %s3891_s7 }
 0xce5   :  { %v3623_v32 = vpop.f32.mrf.mxu0 }
 0xd3d   :  { %v2366_v4 = vpop.permute.xlu0 %2365 }
 0xd3e   :  { %v2396_v18 = vsel %vm620_vm4, %v2390_v39, %v2366_v4 }
 0xd3f   :  { %3632 = vmatprep.mubr.msk.f32.mxu1 %vm187_vm1, %v2396_v18 }
 0xd41   :  { %v2368_v29 = vpop.permute.xlu1 %2367 }
 0xd42   :  { %v2397_v42 = vsel %vm620_vm4, %v2391_v23, %v2368_v29 }
 0xd43   :  { %3633 = vmatmul.mubr.msk.f32.vlgmr.msra.gmra.mxu1 %vm187_vm1, %v2397_v42 }
 0xd49   :  { %v2372_v57 = vpop.permute.xlu1 %2371 }
 0xd4a   :  { %v2399_v12 = vsel %vm620_vm4, %v2393_v50, %v2372_v57 }
 0xd4d   :  { %v2370_v1 = vpop.permute.xlu0 %2369 }
 0xd4e   :  { %v2398_v5 = vsel %vm620_vm4, %v2392_v60, %v2370_v1 }
 0xd4f   :  { %3635 = vmatprep.mubr.msk.f32.mxu1 %vm187_vm1, %v2398_v5 }
 0xd50   :  { %3636 = vmatmul.mubr.msk.f32.gmra.mxu1 %vm187_vm1, %v2399_v12 }
 0xd52   :  { %v2374_v52 = vpop.permute.xlu0 %2373 }
 0xd53   :  { %v2400_v6 = vsel %vm620_vm4, %v2394_v27, %v2374_v52  ;;  %v2634_v27 = vld [vmem:[%s4796_s11 + $0x18] sm:$0xff]  ;;  %v2633_v52 = vld [vmem:[%s4796_s11 + $0x10] sm:$0xff] }
 0xd54   :  { %3638 = vmatprep.mubr.msk.f32.mxu1 %vm187_vm1, %v2400_v6  ;;  %3641 = vmatprep.subr.mxu0 %v2634_v27  ;;  %v2632_v6 = vld [vmem:[%s4796_s11 + $0x8] sm:$0xff] }
 0xd55   :  { %3642 = vmatpush3.msra.mxu0 %v2634_v27 }
 0xd56   :  { %v2376_v59 = vpop.permute.xlu1 %2375  ;;  %3643 = vmatprep.subr.mxu0 %v2633_v52 }
 0xd57   :  { %v2401_v61 = vsel %vm620_vm4, %v2395_v56, %v2376_v59  ;;  %3644 = vmatpush3.msra.mxu0 %v2633_v52 }
 0xd58   :  { %3639 = vmatmul.mubr.msk.f32.gmra.mxu1 %vm187_vm1, %v2401_v61  ;;  %3645 = vmatprep.subr.mxu0 %v2632_v6 }
 0xd59   :  { %3646 = vmatpush3.msra.mxu0 %v2632_v6 }
 0xd5a   :  { %3647 = vmatprep.subr.mxu0 %v2631_v48 }
 0xd5b   :  { %3648 = vmatpush3.msra.mxu0 %v2631_v48 }
 0xe03   :  { %v3634_v8 = vpop.f32.mrf.mxu1 }
 0xe04   :  { %v2503_v10 = vadd.f32 %v3634_v8, %v3169_v9 }
 0xe05   :  { %v2497_v13 = vpop.f32.mrf.mxu1 }
 0xe06   :  { %v2527_v14 = vadd.f32 %v2503_v10, %v4105_v45  ;;  %v2498_v7 = vadd.f32 %v3169_v9, %v2497_v13 }
 0xe08   :  { %v2526_v55 = vadd.f32 %v2498_v7, %v4099_v36  ;;  %v2536_v21 = vsel %vm187_vm1, %v2527_v14, 0.0  ;;  %v2532_v7 = vld [vmem:[%s4795_s10] sm:$0x3] }
 0xe09   :  { %2537 = vadd.xlane.f32.xlu1 %v2536_v21 }
 0xe0a   :  { %v2533_v58 = vsel %vm187_vm1, %v2526_v55, 0.0 }
 0xe0b   :  { %2534 = vadd.xlane.f32.xlu0 %v2533_v58 }
 0xe10   :  { %v3637_v16 = vpop.f32.mrf.mxu1 }
 0xe11   :  { %v2513_v3 = vadd.f32 %v3637_v16, %v3169_v9  ;;  %v2614_v16 = vrot.slane %v2532_v7, %v4089_v25 }
 0xe12   :  { %v2507_v17 = vpop.f32.mrf.mxu1 }
 0xe13   :  { %v2529_v62 = vadd.f32 %v2513_v3, %v4115_v51  ;;  %v2508_v0 = vadd.f32 %v3169_v9, %v2507_v17 }
 0xe15   :  { %v2528_v22 = vadd.f32 %v2508_v0, %v4108_v46  ;;  %v2542_v15 = vsel %vm187_vm1, %v2529_v62, 0.0 }
 0xe16   :  { %2543 = vadd.xlane.f32.xlu0 %v2542_v15 }
 0xe17   :  { %v2539_v36 = vsel %vm187_vm1, %v2528_v22, 0.0 }
 0xe18   :  { %v3640_v45 = vpop.f32.mrf.mxu1 }
 0xe19   :  { %v2523_v24 = vadd.f32 %v3640_v45, %v3169_v9 }
 0xe1a   :  { %v2517_v19 = vpop.f32.mrf.mxu1  ;;  %2540 = vadd.xlane.f32.xlu0 %v2539_v36  ;;  %v2624_v36 = vrot.slane %v2532_v7, %v4094_v28 }
 0xe1b   :  { %v2531_v31 = vadd.f32 %v2523_v24, %v4124_v54  ;;  %v2518_v32 = vadd.f32 %v3169_v9, %v2517_v19 }
 0xe1d   :  { %v2530_v30 = vadd.f32 %v2518_v32, %v4118_v53  ;;  %v2548_v33 = vsel %vm187_vm1, %v2531_v31, 0.0 }
 0xe1e   :  { %2549 = vadd.xlane.f32.xlu1 %v2548_v33 }
 0xe1f   :  { %v2545_v51 = vsel %vm187_vm1, %v2530_v30, 0.0 }
 0xe20   :  { %2546 = vadd.xlane.f32.xlu0 %v2545_v51 }
 0xe92   :  { %v2538_v46 = vpop.xlane.xlu1 %2537 }
 0xe93   :  { %v2552_v34 = vmul.f32 0.03125, %v2538_v46 }
 0xe94   :  { %v2535_v35 = vpop.xlane.xlu0 %2534 }
 0xe95   :  { %v2558_v37 = vsub.f32 %v2527_v14, %v2552_v34  ;;  %v2551_v38 = vmul.f32 0.03125, %v2535_v35 }
 0xe97   :  { %v4657_v40 = vsub.f32 %v2526_v55, %v2551_v38  ;;  %v2564_v43 = vmul.f32 %v2558_v37, %v2558_v37 }
 0xe99   :  { %v2572_v44 = vsel %vm187_vm1, %v2564_v43, 0.0  ;;  %v2563_v54 = vmul.f32 %v4657_v40, %v4657_v40 }
 0xe9a   :  { %2573 = vadd.xlane.f32.xlu1 %v2572_v44 }
 0xe9b   :  { %v2569_v53 = vsel %vm187_vm1, %v2563_v54, 0.0 }
 0xe9c   :  { %2570 = vadd.xlane.f32.xlu0 %v2569_v53 }
 0xe9f   :  { %v2544_v41 = vpop.xlane.xlu0 %2543 }
 0xea0   :  { %v2554_v47 = vmul.f32 0.03125, %v2544_v41 }
 0xea2   :  { %v4663_v49 = vsub.f32 %v2529_v62, %v2554_v47 }
 0xea3   :  { %v2541_v39 = vpop.xlane.xlu0 %2540 }
 0xea4   :  { %v2553_v2 = vmul.f32 0.03125, %v2541_v39  ;;  %v2566_v4 = vmul.f32 %v4663_v49, %v4663_v49 }
 0xea6   :  { %v4667_v18 = vsub.f32 %v2528_v22, %v2553_v2  ;;  %v2578_v20 = vsel %vm187_vm1, %v2566_v4, 0.0 }
 0xea7   :  { %v2550_v23 = vpop.xlane.xlu1 %2549  ;;  %2579 = vadd.xlane.f32.xlu1 %v2578_v20  ;;  %v2816_v20 = vld [vmem:[%s4798_s13 + $0x38] sm:$0xff] }
 0xea8   :  { %v2556_v29 = vmul.f32 0.03125, %v2550_v23  ;;  %v2565_v42 = vmul.f32 %v4667_v18, %v4667_v18  ;;  %3658 = vmatprep.subr.mxu1 %v2816_v20  ;;  %v2815_v23 = vld [vmem:[%s4798_s13 + $0x30] sm:$0xff] }
 0xea9   :  { %v2547_v63 = vpop.xlane.xlu0 %2546  ;;  %3659 = vmatpush3.msra.mxu1 %v2816_v20 }
 0xeaa   :  { %v4672_v57 = vsub.f32 %v2531_v31, %v2556_v29  ;;  %v2555_v26 = vmul.f32 0.03125, %v2547_v63  ;;  %v2575_v60 = vsel %vm187_vm1, %v2565_v42, 0.0  ;;  %3660 = vmatprep.subr.mxu1 %v2815_v23  ;;  %v2814_v29 = vld [vmem:[%s4798_s13 + $0x28] sm:$0xff]  ;;  %v2813_v42 = vld [vmem:[%s4798_s13 + $0x20] sm:$0xff]  ;;  %v2812_v63 = vld [vmem:[%s4798_s13 + $0x18] sm:$0xff] }
 0xeab   :  { %2576 = vadd.xlane.f32.xlu0 %v2575_v60  ;;  %3661 = vmatpush3.msra.mxu1 %v2815_v23  ;;  %v2809_v60 = vld [vmem:[%s4798_s13] sm:$0xff] }
 0xeac   :  { %v4675_v1 = vsub.f32 %v2530_v30, %v2555_v26  ;;  %v2568_v50 = vmul.f32 %v4672_v57, %v4672_v57  ;;  %3662 = vmatprep.subr.mxu1 %v2814_v29  ;;  %v2810_v26 = vld [vmem:[%s4798_s13 + $0x8] sm:$0xff] }
 0xead   :  { %3663 = vmatpush3.msra.mxu1 %v2814_v29 }
 0xeae   :  { %v2584_v5 = vsel %vm187_vm1, %v2568_v50, 0.0  ;;  %v2567_v12 = vmul.f32 %v4675_v1, %v4675_v1  ;;  %3664 = vmatprep.subr.mxu1 %v2813_v42 }
 0xeaf   :  { %2585 = vadd.xlane.f32.xlu1 %v2584_v5  ;;  %3665 = vmatpush3.msra.mxu1 %v2813_v42 }
 0xeb0   :  { %v2581_v11 = vsel %vm187_vm1, %v2567_v12, 0.0  ;;  %3666 = vmatprep.subr.mxu1 %v2812_v63 }
 0xeb1   :  { %2582 = vadd.xlane.f32.xlu0 %v2581_v11  ;;  %3667 = vmatpush3.msra.mxu1 %v2812_v63 }
 0xf23   :  { %v2574_v56 = vpop.xlane.xlu1 %2573 }
 0xf24   :  { %v2588_v59 = vmul.f32 0.03125, %v2574_v56 }
 0xf25   :  { %v2571_v61 = vpop.xlane.xlu0 %2570 }
 0xf26   :  { %v2594_v9 = vadd.f32 1e-12, %v2588_v59  ;;  %v2587_v8 = vmul.f32 0.03125, %v2571_v61 }
 0xf28   :  { %3826 = vrsqrt.f32 %v2594_v9  ;;  %v2593_v10 = vadd.f32 1e-12, %v2587_v8 }
 0xf2a   :  { %3828 = vrsqrt.f32 %v2593_v10 }
 0xf30   :  { %v2580_v13 = vpop.xlane.xlu1 %2579 }
 0xf31   :  { %v2590_v14 = vmul.f32 0.03125, %v2580_v13 }
 0xf33   :  { %v2596_v55 = vadd.f32 1e-12, %v2590_v14 }
 0xf34   :  { %v2577_v21 = vpop.xlane.xlu0 %2576 }
 0xf35   :  { %v3827_v58 = vpop.eup %3826  ;;  %3830 = vrsqrt.f32 %v2596_v55  ;;  %v2589_v3 = vmul.f32 0.03125, %v2577_v21 }
 0xf36   :  { %v2606_v17 = vmul.f32 %v3827_v58, %v2558_v37 }
 0xf37   :  { %v3829_v62 = vpop.eup %3828  ;;  %v2595_v0 = vadd.f32 1e-12, %v2589_v3 }
 0xf38   :  { %v2586_v22 = vpop.xlane.xlu1 %2585  ;;  %v2605_v15 = vmul.f32 %v3829_v62, %v4657_v40  ;;  %v2616_v45 = vmul.f32 %v2614_v16, %v2606_v17 }
 0xf39   :  { %3832 = vrsqrt.f32 %v2595_v0  ;;  %v2592_v24 = vmul.f32 0.03125, %v2586_v22 }
 0xf3a   :  { %v2583_v19 = vpop.xlane.xlu0 %2582  ;;  %v2615_v31 = vmul.f32 %v2614_v16, %v2605_v15  ;;  %v2626_v46 = vadd.f32 %v2624_v36, %v2616_v45 }
 0xf3b   :  { %v2598_v32 = vadd.f32 1e-12, %v2592_v24  ;;  %v2591_v30 = vmul.f32 0.03125, %v2583_v19 }
 0xf3c   :  { %v2625_v33 = vadd.f32 %v2624_v36, %v2615_v31 }
 0xf3d   :  { %3834 = vrsqrt.f32 %v2598_v32  ;;  %v2597_v51 = vadd.f32 1e-12, %v2591_v30 }
 0xf3e   :  { %3649 = vmatprep.mubr.msk.f32.mxu0 %vm187_vm1, %v2625_v33 }
 0xf3f   :  { %3836 = vrsqrt.f32 %v2597_v51  ;;  %3650 = vmatmul.mubr.msk.f32.vlgmr.msra.gmra.mxu0 %vm187_vm1, %v2626_v46 }
 0xf42   :  { %v3831_v34 = vpop.eup %3830 }
 0xf43   :  { %v2608_v35 = vmul.f32 %v3831_v34, %v4663_v49 }
 0xf45   :  { %v2618_v40 = vmul.f32 %v2614_v16, %v2608_v35 }
 0xf46   :  { %v3833_v37 = vpop.eup %3832 }
 0xf47   :  { %v2607_v38 = vmul.f32 %v3833_v37, %v4667_v18  ;;  %v2628_v47 = vadd.f32 %v2624_v36, %v2618_v40 }
 0xf49   :  { %v2617_v43 = vmul.f32 %v2614_v16, %v2607_v38 }
 0xf4a   :  { %v3835_v44 = vpop.eup %3834 }
 0xf4b   :  { %v4705_v54 = vadd.f32 %v2624_v36, %v2617_v43  ;;  %v2610_v53 = vmul.f32 %v3835_v44, %v4672_v57  ;;  %v2811_v57 = vld [vmem:[%s4798_s13 + $0x10] sm:$0xff] }
 0xf4c   :  { %v3837_v41 = vpop.eup %3836  ;;  %3668 = vmatprep.subr.mxu1 %v2811_v57 }
 0xf4d   :  { %3652 = vmatprep.mubr.msk.f32.mxu0 %vm187_vm1, %v4705_v54  ;;  %v2609_v39 = vmul.f32 %v3837_v41, %v4675_v1  ;;  %v2620_v49 = vmul.f32 %v2614_v16, %v2610_v53  ;;  %3669 = vmatpush3.msra.mxu1 %v2811_v57  ;;  %v3176_v1 = vld [vmem:[%s4797_s12] ss:$0 sm:$0xff] }
 0xf4e   :  { %3653 = vmatmul.mubr.msk.f32.gmra.mxu0 %vm187_vm1, %v2628_v47  ;;  %3670 = vmatprep.subr.mxu1 %v2810_v26 }
 0xf4f   :  { %v2619_v2 = vmul.f32 %v2614_v16, %v2609_v39  ;;  %v4712_v18 = vadd.f32 %v2624_v36, %v2620_v49  ;;  %3671 = vmatpush3.msra.mxu1 %v2810_v26 }
 0xf50   :  { %3672 = vmatprep.subr.mxu1 %v2809_v60 }
 0xf51   :  { %v2629_v4 = vadd.f32 %v2624_v36, %v2619_v2  ;;  %3673 = vmatpush3.msra.mxu1 %v2809_v60 }
 0xf53   :  { %3655 = vmatprep.mubr.msk.f32.mxu0 %vm187_vm1, %v2629_v4 }
 0xf54   :  { %3656 = vmatmul.mubr.msk.f32.gmra.mxu0 %vm187_vm1, %v4712_v18 }
 0xfff   :  { %v3651_v50 = vpop.f32.mrf.mxu0 }
0x1000   :  { %v2732_v5 = vadd.f32 %v3651_v50, %v3176_v1 }
0x1001   :  { %v2726_v12 = vpop.f32.mrf.mxu0 }
0x1002   :  { %v2756_v11 = vmul.f32 %v2732_v5, %v2732_v5  ;;  %v2727_v27 = vadd.f32 %v3176_v1, %v2726_v12 }
0x1004   :  { %v2762_v52 = vmul.f32 %v2756_v11, %v2732_v5  ;;  %v2755_v6 = vmul.f32 %v2727_v27, %v2727_v27 }
0x1006   :  { %v2768_v48 = vmul.f32 0.044715, %v2762_v52  ;;  %v2761_v56 = vmul.f32 %v2755_v6, %v2727_v27 }
0x1008   :  { %v2774_v59 = vadd.f32 %v2768_v48, %v2732_v5  ;;  %v2767_v61 = vmul.f32 0.044715, %v2761_v56 }
0x100a   :  { %v2780_v9 = vmul.f32 0.7978846, %v2774_v59  ;;  %v2773_v8 = vadd.f32 %v2767_v61, %v2727_v27  ;;  %v3183_v59 = vld [vmem:[%s4799_s14] ss:$0 sm:$0xff] }
0x100c   :  { %3838 = vtanh.f32 %v2780_v9  ;;  %v2779_v10 = vmul.f32 0.7978846, %v2773_v8 }
0x100e   :  { %3840 = vtanh.f32 %v2779_v10  ;;  %v3654_v13 = vpop.f32.mrf.mxu0 }
0x100f   :  { %v2742_v14 = vadd.f32 %v3654_v13, %v3176_v1 }
0x1010   :  { %v2736_v7 = vpop.f32.mrf.mxu0 }
0x1011   :  { %v2758_v55 = vmul.f32 %v2742_v14, %v2742_v14  ;;  %v2737_v21 = vadd.f32 %v3176_v1, %v2736_v7 }
0x1013   :  { %v2764_v58 = vmul.f32 %v2758_v55, %v2742_v14  ;;  %v2757_v16 = vmul.f32 %v2737_v21, %v2737_v21 }
0x1014   :  { %v3657_v3 = vpop.f32.mrf.mxu0 }
0x1015   :  { %v2770_v17 = vmul.f32 0.044715, %v2764_v58  ;;  %v2763_v62 = vmul.f32 %v2757_v16, %v2737_v21  ;;  %v2752_v0 = vadd.f32 %v3657_v3, %v3176_v1 }
0x1016   :  { %v2746_v22 = vpop.f32.mrf.mxu0 }
0x1017   :  { %v2776_v15 = vadd.f32 %v2770_v17, %v2742_v14  ;;  %v2769_v45 = vmul.f32 0.044715, %v2763_v62  ;;  %v2760_v24 = vmul.f32 %v2752_v0, %v2752_v0  ;;  %v2747_v36 = vadd.f32 %v3176_v1, %v2746_v22 }
0x1019   :  { %v3839_v19 = vpop.eup %3838  ;;  %v2782_v31 = vmul.f32 0.7978846, %v2776_v15  ;;  %v2775_v32 = vadd.f32 %v2769_v45, %v2737_v21  ;;  %v2766_v30 = vmul.f32 %v2760_v24, %v2752_v0  ;;  %v2759_v33 = vmul.f32 %v2747_v36, %v2747_v36  ;;  %v2977_v24 = vld [vmem:[%s4801_s16 + $0x10] sm:$0xff] }
0x101a   :  { %v2792_v51 = vadd.f32 1.0, %v3839_v19  ;;  %v2975_v19 = vld [vmem:[%s4801_s16] sm:$0xff] }
0x101b   :  { %v3841_v46 = vpop.eup %3840  ;;  %3842 = vtanh.f32 %v2782_v31  ;;  %v2781_v34 = vmul.f32 0.7978846, %v2775_v32  ;;  %v2772_v35 = vmul.f32 0.044715, %v2766_v30  ;;  %v2765_v37 = vmul.f32 %v2759_v33, %v2747_v36 }
0x101c   :  { %v2791_v38 = vadd.f32 1.0, %v3841_v46  ;;  %v2798_v40 = vmul.f32 0.5, %v2792_v51 }
0x101d   :  { %3844 = vtanh.f32 %v2781_v34  ;;  %v2778_v43 = vadd.f32 %v2772_v35, %v2752_v0  ;;  %v2771_v44 = vmul.f32 0.044715, %v2765_v37  ;;  %v2936_v34 = vld [vmem:[%s4800_s15] sm:$0x3]  ;;  %s3892_s15 = smov [#allocation2]  }
0x101e   :  { %v2797_v53 = vmul.f32 0.5, %v2791_v38  ;;  %v2804_v49 = vmul.f32 %v2798_v40, %v2732_v5  ;;  %v2966_v35 = vrot.slane %v2936_v34, %v4089_v25  ;;  %v2972_v40 = vrot.slane %v2936_v34, %v4094_v28  ;;  %s3074_s6 = sshll.u32 %s3892_s15, 4  ;;  %s3075_s6 = int_to_ptr.vmem [resolvable:$true] %s3074_s6 }
0x101f   :  { %v2784_v41 = vmul.f32 0.7978846, %v2778_v43  ;;  %v2777_v47 = vadd.f32 %v2771_v44, %v2747_v36  ;;  %s3854_s23 = scalar_lea.vmem %s3075_s6, 256  ;;  %p3859_p1 = scmp.lt.s32.totalorder %s3075_s6, %s3075_s6 }
0x1020   :  { %v2803_v39 = vmul.f32 %v2797_v53, %v2727_v27  ;;  %p3855_p0 = scmp.ne.s32.totalorder %s3075_s6, %s3854_s23  ;;  %p3860_p2 = scmp.lt.s32.totalorder %s3854_s23, %s3854_s23 }
0x1021   :  { %3846 = vtanh.f32 %v2784_v41  ;;  %v2783_v2 = vmul.f32 0.7978846, %v2777_v47 }
0x1022   :  { %3674 = vmatprep.mubr.msk.f32.mxu1 %vm2824_vm6, %v2803_v39  ;;  %p3861_p3 = por %p3860_p2, %p3859_p1 }
0x1023   :  { %3848 = vtanh.f32 %v2783_v2  ;;  %3675 = vmatmul.mubr.msk.f32.vlgmr.msra.gmra.mxu1 %vm2824_vm6, %v2804_v49  ;;  %v3190_v49 = vld [vmem:[%s4802_s17] ss:$0 sm:$0xff] }
0x1024   :  { %p3862_p4 = pnand %p3861_p3, %p3855_p0 }
0x1028   :  { %v3843_v4 = vpop.eup %3842 }
0x1029   :  { %v2794_v20 = vadd.f32 1.0, %v3843_v4 }
0x102a   :  { %v3845_v23 = vpop.eup %3844 }
0x102b   :  { %v2793_v29 = vadd.f32 1.0, %v3845_v23  ;;  %v2800_v42 = vmul.f32 0.5, %v2794_v20 }
0x102d   :  { %v2799_v63 = vmul.f32 0.5, %v2793_v29  ;;  %v2806_v50 = vmul.f32 %v2800_v42, %v2742_v14 }
0x102e   :  { %v3847_v57 = vpop.eup %3846 }
0x102f   :  { %v2805_v26 = vmul.f32 %v2799_v63, %v2737_v21  ;;  %v2796_v60 = vadd.f32 1.0, %v3847_v57 }
0x1030   :  { %v3849_v1 = vpop.eup %3848 }
0x1031   :  { %3677 = vmatprep.mubr.msk.f32.mxu1 %vm2824_vm6, %v2805_v26  ;;  %v2795_v5 = vadd.f32 1.0, %v3849_v1  ;;  %v2802_v12 = vmul.f32 0.5, %v2796_v60 }
0x1032   :  { %3678 = vmatmul.mubr.msk.f32.gmra.mxu1 %vm2824_vm6, %v2806_v50 }
0x1033   :  { %v2801_v11 = vmul.f32 0.5, %v2795_v5  ;;  %v2808_v52 = vmul.f32 %v2802_v12, %v2752_v0 }
0x1035   :  { %v2807_v27 = vmul.f32 %v2801_v11, %v2747_v36  ;;  %v2976_v36 = vld [vmem:[%s4801_s16 + $0x8] sm:$0xff] }
0x1037   :  { %3680 = vmatprep.mubr.msk.f32.mxu1 %vm2824_vm6, %v2807_v27 }
0x1038   :  { %3681 = vmatmul.mubr.msk.f32.gmra.mxu1 %vm2824_vm6, %v2808_v52 }
0x10e3   :  { %v3676_v6 = vpop.f32.mrf.mxu1 }
0x10e5   :  { %v2909_v48 = vpop.f32.mrf.mxu1 }
0x10f2   :  { %v3679_v56 = vpop.f32.mrf.mxu1 }
0x10f4   :  { %v2917_v61 = vpop.f32.mrf.mxu1 }
0x10f5   :  { %v2918_v9 = vadd.f32 %v3183_v59, %v2917_v61 }
0x10f7   :  { %v2934_v8 = vadd.f32 %v2918_v9, %v4705_v54 }
0x10f8   :  { %v3682_v10 = vpop.f32.mrf.mxu1 }
0x10f9   :  { %v2931_v13 = vadd.f32 %v3682_v10, %v3183_v59  ;;  %v2937_v14 = vsel %vm187_vm1, %v2934_v8, 0.0 }
0x10fa   :  { %v2926_v7 = vpop.f32.mrf.mxu1  ;;  %2938 = vadd.xlane.f32.xlu0 %v2937_v14 }
0x10fb   :  { %v2935_v55 = vadd.f32 %v2931_v13, %v4712_v18  ;;  %v2978_v18 = vld [vmem:[%s4801_s16 + $0x18] sm:$0xff] }
0x10fc   :  { %3683 = vmatprep.subr.mxu0 %v2978_v18 }
0x10fd   :  { %v2940_v21 = vsel %vm187_vm1, %v2935_v55, 0.0  ;;  %3684 = vmatpush3.msra.mxu0 %v2978_v18 }
0x10fe   :  { %2941 = vadd.xlane.f32.xlu1 %v2940_v21  ;;  %3685 = vmatprep.subr.mxu0 %v2977_v24 }
0x10ff   :  { %3686 = vmatpush3.msra.mxu0 %v2977_v24 }
0x1100   :  { %3687 = vmatprep.subr.mxu0 %v2976_v36 }
0x1101   :  { %3688 = vmatpush3.msra.mxu0 %v2976_v36 }
0x1102   :  { %3689 = vmatprep.subr.mxu0 %v2975_v19 }
0x1103   :  { %3690 = vmatpush3.msra.mxu0 %v2975_v19 }
0x1183   :  { %v2939_v58 = vpop.xlane.xlu0 %2938 }
0x1184   :  { %v2943_v16 = vmul.f32 0.03125, %v2939_v58 }
0x1186   :  { %v2945_v3 = vsub.f32 %v2934_v8, %v2943_v16 }
0x1187   :  { %v2942_v17 = vpop.xlane.xlu1 %2941 }
0x1188   :  { %v2944_v62 = vmul.f32 0.03125, %v2942_v17  ;;  %v2947_v0 = vmul.f32 %v2945_v3, %v2945_v3 }
0x118a   :  { %v2946_v22 = vsub.f32 %v2935_v55, %v2944_v62  ;;  %v2949_v54 = vsel %vm187_vm1, %v2947_v0, 0.0 }
0x118b   :  { %2950 = vadd.xlane.f32.xlu0 %v2949_v54 }
0x118c   :  { %v2948_v15 = vmul.f32 %v2946_v22, %v2946_v22 }
0x118e   :  { %v2952_v45 = vsel %vm187_vm1, %v2948_v15, 0.0 }
0x118f   :  { %2953 = vadd.xlane.f32.xlu1 %v2952_v45 }
0x1214   :  { %v2951_v31 = vpop.xlane.xlu0 %2950 }
0x1215   :  { %v2955_v32 = vmul.f32 0.03125, %v2951_v31 }
0x1217   :  { %v2957_v30 = vadd.f32 1e-12, %v2955_v32 }
0x1218   :  { %v2954_v33 = vpop.xlane.xlu1 %2953 }
0x1219   :  { %3850 = vrsqrt.f32 %v2957_v30  ;;  %v2956_v51 = vmul.f32 0.03125, %v2954_v33 }
0x121b   :  { %v2958_v46 = vadd.f32 1e-12, %v2956_v51 }
0x121d   :  { %3852 = vrsqrt.f32 %v2958_v46 }
0x1226   :  { %v3851_v37 = vpop.eup %3850 }
0x1227   :  { %v2961_v38 = vmul.f32 %v3851_v37, %v2945_v3 }
0x1229   :  { %v2967_v43 = vmul.f32 %v2966_v35, %v2961_v38 }
0x122a   :  { %v3853_v44 = vpop.eup %3852 }
0x122b   :  { %v2962_v53 = vmul.f32 %v3853_v44, %v2946_v22  ;;  %v2973_v41 = vadd.f32 %v2972_v40, %v2967_v43 }
0x122d   :  { %v2968_v47 = vmul.f32 %v2966_v35, %v2962_v53  ;;  %3691 = vmatprep.mubr.msk.f32.mxu0 %vm187_vm1, %v2973_v41 }
0x122f   :  { %v2974_v39 = vadd.f32 %v2972_v40, %v2968_v47 }
0x1231   :  { %3692 = vmatmul.mubr.msk.f32.vlgmr.msra.gmra.mxu0 %vm187_vm1, %v2974_v39 }
0x12f1   :  { %v3693_v2 = vpop.f32.mrf.mxu0 }
0x12f2   :  { %v3064_v25 = vadd.f32 %v3693_v2, %v3190_v49 }
0x12f3   :  { %v3058_v4 = vpop.f32.mrf.mxu0 }
0x12f4   :  { %3068 = vst [vmem:[#allocation2 + $0x8] sm:$0xff] %v3064_v25  ;;  %v3059_v28 = vadd.f32 %v3190_v49, %v3058_v4 }
0x12f6   :  { %3067 = vst [vmem:[#allocation2] sm:$0xff] %v3059_v28 }
0x12f7   :  { %3865 = shalt.err (!%p3862_p4)
}
0x12f8   :  { %s3893_s5 = smov 128  }
0x12f9   :  { %3080 = dma.vmem_to_hbm [thread:$0]  %s3075_s6, 256, %s4803_s18, [#allocation3], %s3893_s5, %s3893_s5, %s3889_s3  }
0x12fa   :  { %3874 = dma.done.wait [#allocation3], 256  }
0x12fb   :  { %3875 = vsyncadd [#allocation3], 4294967040 }
0x12fc   :  { %3084 = vsyncpa [#allocation3], 1 }

</bundles_post_ra>
